<compile_context>
chip_gen: v7x
topology: tpu7x:2x2x1
jax: 0.10.0
libtpu: 0.0.40
codegen_flags: <defaults>
</compile_context>

<pallas_src>
import functools
import math

import jax
import jax.numpy as jnp
from jax.experimental import pallas as pl
from jax.experimental.pallas import tpu as pltpu

ENTROPY_WEIGHT = 0.1


def _choose_row_tile(B, block_b):
    # Single tile covers any (B, H): block == full array dims is always legal.
    if B <= max(block_b, 128):
        return B
    # Multi-tile: bt must be a multiple of 128 so the transposed (3, bt) weights
    # block is lane-aligned (and the (bt, H) stream blocks 8-sublane aligned).
    # Aim for >= 2 grid steps so the v7x megacore can split the parallel axis.
    target = min(block_b, pl.cdiv(B, 2))
    bt = max(128, ((target + 127) // 128) * 128)
    return B if bt >= B else bt


def _vmem_limit_bytes(bt, H, stream_itemsize, fused_itemsize, w_itemsize):
    # Pipelined (double-buffered) per-step blocks: 3 streams + fused + (3, bt).
    pipelined = bt * H * (3 * stream_itemsize + fused_itemsize) + 3 * bt * 4
    # Whole-array VMEM residents: 3x(H,H) W1 slabs + b1 + W2 + b2 + W2^T + b2^T.
    resident = 3 * H * H * w_itemsize + (4 * H + 9) * 4
    est = 4 * pipelined + 2 * resident + (8 << 20)   # generous headroom
    return int(min(max(est, 32 << 20), 128 << 20))


def _fusion_kernel(frame_ref, seg_ref, utt_ref,
                   w1f_ref, w1s_ref, w1u_ref, b1_ref,
                   w2_ref, b2_ref, w2t_ref, b2t_ref,
                   fused_ref, wt_ref, *, compute_dtype, approx):
    # Blocked:  frame/seg/utt (bt, H); fused (bt, H); wt (3, bt).
    # Resident: w1* (H, H); b1 (1, H); w2 (H, 3); b2 (1, 3); w2t (3, H); b2t (3, 1).
    frame = frame_ref[...]
    seg = seg_ref[...]
    utt = utt_ref[...]

    def mm(x, w_ref):
        return jnp.dot(x.astype(compute_dtype), w_ref[...],
                       preferred_element_type=jnp.float32)

    # Linear(3H -> H) as three per-stream MXU matmuls (f32 accumulation) + ReLU.
    h = mm(frame, w1f_ref) + mm(seg, w1s_ref) + mm(utt, w1u_ref) + b1_ref[...]
    h = jnp.maximum(h, 0.0)

    # Linear(H -> 3) + softmax in (bt, 3) layout, used for the fusion broadcast.
    logits = jnp.dot(h, w2_ref[...], preferred_element_type=jnp.float32) + b2_ref[...]
    m = jnp.max(logits, axis=-1, keepdims=True)
    e = jnp.exp(logits - m)
    w = e * pl.reciprocal(jnp.sum(e, axis=-1, keepdims=True), approx=approx)

    # Same logits in transposed (3, bt) layout via a second tiny MXU matmul
    # (contract on H), so the aux output block is lane-dense (full vst).
    logits_t = jax.lax.dot_general(
        w2t_ref[...], h, (((1,), (1,)), ((), ())),
        preferred_element_type=jnp.float32) + b2t_ref[...]
    mt = jnp.max(logits_t, axis=0, keepdims=True)
    et = jnp.exp(logits_t - mt)
    wt = et * pl.reciprocal(jnp.sum(et, axis=0, keepdims=True), approx=approx)
    wt_ref[...] = wt.astype(wt_ref.dtype)

    # Weighted fusion of the three pooled streams (f32 elementwise math).
    f32 = jnp.float32
    fused = (w[:, 0:1] * frame.astype(f32)
             + w[:, 1:2] * seg.astype(f32)
             + w[:, 2:3] * utt.astype(f32))
    fused_ref[...] = fused.astype(fused_ref.dtype)


def entropy_regularized_fusion(frame_pooled, segment_pooled, utterance_pooled,
                               w1, b1, w2, b2, *,
                               entropy_weight=ENTROPY_WEIGHT,
                               block_b=512,
                               compute_dtype=jnp.bfloat16,
                               approx_softmax=False,
                               fused_dtype=None):
    """frame/segment/utterance_pooled: (B, H) (f32 or bf16).
    w1: (3H, H), b1: (H,), w2: (H, 3), b2: (3,).
    Returns (fused (B, H), fusion_weights (B, 3) f32, entropy_loss scalar)."""
    B, H = frame_pooled.shape
    assert segment_pooled.shape == (B, H) and utterance_pooled.shape == (B, H)
    assert w1.shape == (3 * H, H) and b1.shape == (H,)
    assert w2.shape == (H, 3) and b2.shape == (3,)
    if fused_dtype is None:
        fused_dtype = frame_pooled.dtype

    # Split the first Linear's weight into per-stream slabs (replaces the concat);
    # bf16 slabs in HBM halve weight DMA / VMEM when compute_dtype=bf16.
    w1f, w1s, w1u = w1[0:H], w1[H:2 * H], w1[2 * H:3 * H]
    if jnp.dtype(compute_dtype) != w1.dtype:
        w1f, w1s, w1u = (t.astype(compute_dtype) for t in (w1f, w1s, w1u))
    b1_2d = b1.reshape(1, H).astype(jnp.float32)
    w2_f32 = w2.astype(jnp.float32)
    b2_2d = b2.reshape(1, 3).astype(jnp.float32)
    w2t_f32 = w2_f32.T                               # (3, H) for the transposed logits
    b2t_2d = b2.reshape(3, 1).astype(jnp.float32)

    bt = _choose_row_tile(B, block_b)
    num_tiles = pl.cdiv(B, bt)

    row_spec = pl.BlockSpec((bt, H), lambda i: (i, 0))
    vmem_whole = pl.BlockSpec(memory_space=pltpu.MemorySpace.VMEM)  # resident, unblocked

    s_it = jnp.dtype(frame_pooled.dtype).itemsize
    f_it = jnp.dtype(fused_dtype).itemsize
    w_it = jnp.dtype(compute_dtype).itemsize

    kernel = functools.partial(_fusion_kernel,
                               compute_dtype=compute_dtype,
                               approx=approx_softmax)

    fused, weights_t = pl.pallas_call(
        kernel,
        grid=(num_tiles,),
        in_specs=[row_spec, row_spec, row_spec,
                  vmem_whole, vmem_whole, vmem_whole, vmem_whole,   # w1f, w1s, w1u, b1
                  vmem_whole, vmem_whole, vmem_whole, vmem_whole],  # w2, b2, w2t, b2t
        out_specs=(pl.BlockSpec((bt, H), lambda i: (i, 0)),
                   pl.BlockSpec((3, bt), lambda i: (0, i))),
        out_shape=(jax.ShapeDtypeStruct((B, H), fused_dtype),
                   jax.ShapeDtypeStruct((3, B), jnp.float32)),
        compiler_params=pltpu.CompilerParams(
            dimension_semantics=("parallel",),
            vmem_limit_bytes=_vmem_limit_bytes(bt, H, s_it, f_it, w_it)),
        cost_estimate=pl.CostEstimate(
            flops=6 * B * H * H + 24 * B * H,
            transcendentals=8 * B,
            bytes_accessed=(B * H * (3 * s_it + f_it) + 3 * B * 4
                            + 3 * H * H * w_it + (4 * H + 9) * 4)),
    )(frame_pooled, segment_pooled, utterance_pooled,
      w1f, w1s, w1u, b1_2d, w2_f32, b2_2d, w2t_f32, b2t_2d)

    # Tiny XLA ops on (3, B): transpose back + exact PyTorch entropy formula.
    fusion_weights = weights_t.T                                  # (B, 3)
    entropy = -jnp.sum(fusion_weights * jnp.log(fusion_weights + 1e-8), axis=-1)
    entropy_loss = (-float(entropy_weight) / math.log(3.0)) * jnp.mean(entropy)
    return fused, fusion_weights, entropy_loss


def _reference(frame, seg, utt, w1, b1, w2, b2, entropy_weight=ENTROPY_WEIGHT):
    x = jnp.concatenate([frame, seg, utt], axis=-1)
    h = jnp.maximum(x @ w1 + b1, 0.0)
    logits = h @ w2 + b2
    w = jax.nn.softmax(logits, axis=-1)
    entropy = -jnp.sum(w * jnp.log(w + 1e-8), axis=-1)
    loss = -entropy_weight * jnp.mean(entropy / jnp.log(3.0))
    fused = w[:, 0:1] * frame + w[:, 1:2] * seg + w[:, 2:3] * utt
    return fused, w, loss


if __name__ == "__main__":
    key = jax.random.PRNGKey(0)

    def make(B, H, k):
        kf, ks, ku, kp1, kp2, kb1, kb2 = jax.random.split(k, 7)
        frame = jax.random.normal(kf, (B, H), jnp.float32)
        seg = jax.random.normal(ks, (B, H), jnp.float32)
        utt = jax.random.normal(ku, (B, H), jnp.float32)
        w1 = jax.random.normal(kp1, (3 * H, H), jnp.float32) / jnp.sqrt(3.0 * H)
        b1 = 0.01 * jax.random.normal(kb1, (H,), jnp.float32)
        w2 = jax.random.normal(kp2, (H, 3), jnp.float32) / jnp.sqrt(1.0 * H)
        b2 = 0.01 * jax.random.normal(kb2, (3,), jnp.float32)
        return frame, seg, utt, w1, b1, w2, b2

    k1, k2 = jax.random.split(key)

    # Config 1: faithful path (f32 MXU operands, exact reciprocal) on a
    # multi-tile ragged grid (B=200, bt=128 -> blocks of 128 and 72 rows).
    args = make(200, 32, k1)
    rf, rw, rl = _reference(*args)
    fused, weights, loss = entropy_regularized_fusion(
        *args, block_b=128, compute_dtype=jnp.float32, approx_softmax=False)
    jax.block_until_ready((fused, weights, loss))
    assert jnp.allclose(fused, rf, atol=1e-5), "fused mismatch (f32 path)"
    assert jnp.allclose(weights, rw, atol=1e-5), "weights mismatch (f32 path)"
    assert jnp.allclose(loss, rl, atol=1e-5), "loss mismatch (f32 path)"

    # Config 2: default fast path (bf16 W1 operands, f32 accumulation, approx
    # EUP reciprocal), single tile, lane-aligned H=128.
    args = make(40, 128, k2)
    rf, rw, rl = _reference(*args)
    fused, weights, loss = entropy_regularized_fusion(*args, approx_softmax=True)
    jax.block_until_ready((fused, weights, loss))
    assert jnp.allclose(fused, rf, atol=5e-2, rtol=5e-2), "fused mismatch (bf16 path)"
    assert jnp.allclose(weights, rw, atol=5e-2), "weights mismatch (bf16 path)"
    assert jnp.allclose(loss, rl, atol=5e-2), "loss mismatch (bf16 path)"

    print("KERNEL_OK")
</pallas_src>

<mosaic_0001>
module attributes {stable_mosaic.version = 11 : i64} {
  func.func @_fusion_kernel(%arg0: i32, %arg1: memref<128x32xf32, #tpu.memory_space<vmem>>, %arg2: memref<128x32xf32, #tpu.memory_space<vmem>>, %arg3: memref<128x32xf32, #tpu.memory_space<vmem>>, %arg4: memref<32x32xf32, #tpu.memory_space<vmem>>, %arg5: memref<32x32xf32, #tpu.memory_space<vmem>>, %arg6: memref<32x32xf32, #tpu.memory_space<vmem>>, %arg7: memref<1x32xf32, #tpu.memory_space<vmem>>, %arg8: memref<32x3xf32, #tpu.memory_space<vmem>>, %arg9: memref<1x3xf32, #tpu.memory_space<vmem>>, %arg10: memref<3x32xf32, #tpu.memory_space<vmem>>, %arg11: memref<3x1xf32, #tpu.memory_space<vmem>>, %arg12: memref<128x32xf32, #tpu.memory_space<vmem>>, %arg13: memref<3x128xf32, #tpu.memory_space<vmem>>) attributes {dimension_semantics = [#tpu.dimension_semantics<parallel>], iteration_bounds = array<i64: 2>, scalar_prefetch = 0 : i64, scratch_operands = 0 : i64, tpu.core_type = #tpu.core_type<tc>, window_params = [{transform_indices = @transform_0, window_bounds = array<i64: 128, 32>}, {transform_indices = @transform_1, window_bounds = array<i64: 128, 32>}, {transform_indices = @transform_2, window_bounds = array<i64: 128, 32>}, {pipeline_mode = #tpu.pipeline_mode<synchronous>, transform_indices = @transform_3, window_bounds = array<i64: 32, 32>}, {pipeline_mode = #tpu.pipeline_mode<synchronous>, transform_indices = @transform_4, window_bounds = array<i64: 32, 32>}, {pipeline_mode = #tpu.pipeline_mode<synchronous>, transform_indices = @transform_5, window_bounds = array<i64: 32, 32>}, {pipeline_mode = #tpu.pipeline_mode<synchronous>, transform_indices = @transform_6, window_bounds = array<i64: 1, 32>}, {pipeline_mode = #tpu.pipeline_mode<synchronous>, transform_indices = @transform_7, window_bounds = array<i64: 32, 3>}, {pipeline_mode = #tpu.pipeline_mode<synchronous>, transform_indices = @transform_8, window_bounds = array<i64: 1, 3>}, {pipeline_mode = #tpu.pipeline_mode<synchronous>, transform_indices = @transform_9, window_bounds = array<i64: 3, 32>}, {pipeline_mode = #tpu.pipeline_mode<synchronous>, transform_indices = @transform_10, window_bounds = array<i64: 3, 1>}, {transform_indices = @transform_11, window_bounds = array<i64: 128, 32>}, {transform_indices = @transform_12, window_bounds = array<i64: 3, 128>}]} {
    %c0 = arith.constant 0 : index
    %c0_0 = arith.constant 0 : index
    %0 = vector.load %arg1[%c0, %c0_0] : memref<128x32xf32, #tpu.memory_space<vmem>>, vector<128x32xf32>
    %c0_1 = arith.constant 0 : index
    %c0_2 = arith.constant 0 : index
    %1 = vector.load %arg2[%c0_1, %c0_2] : memref<128x32xf32, #tpu.memory_space<vmem>>, vector<128x32xf32>
    %c0_3 = arith.constant 0 : index
    %c0_4 = arith.constant 0 : index
    %2 = vector.load %arg3[%c0_3, %c0_4] : memref<128x32xf32, #tpu.memory_space<vmem>>, vector<128x32xf32>
    %c0_5 = arith.constant 0 : index
    %c0_6 = arith.constant 0 : index
    %3 = vector.load %arg4[%c0_5, %c0_6] : memref<32x32xf32, #tpu.memory_space<vmem>>, vector<32x32xf32>
    %cst = arith.constant dense<0.000000e+00> : vector<128x32xf32>
    %4 = tpu.matmul %0, %3, %cst {dimension_numbers = #tpu.dot_dimension_numbers<[1], [0], [0], [1], [0, 0, 1, 1], [], []>} : vector<128x32xf32>, vector<32x32xf32>, vector<128x32xf32> -> vector<128x32xf32>
    %c0_7 = arith.constant 0 : index
    %c0_8 = arith.constant 0 : index
    %5 = vector.load %arg5[%c0_7, %c0_8] : memref<32x32xf32, #tpu.memory_space<vmem>>, vector<32x32xf32>
    %cst_9 = arith.constant dense<0.000000e+00> : vector<128x32xf32>
    %6 = tpu.matmul %1, %5, %cst_9 {dimension_numbers = #tpu.dot_dimension_numbers<[1], [0], [0], [1], [0, 0, 1, 1], [], []>} : vector<128x32xf32>, vector<32x32xf32>, vector<128x32xf32> -> vector<128x32xf32>
    %7 = arith.addf %4, %6 : vector<128x32xf32>
    %c0_10 = arith.constant 0 : index
    %c0_11 = arith.constant 0 : index
    %8 = vector.load %arg6[%c0_10, %c0_11] : memref<32x32xf32, #tpu.memory_space<vmem>>, vector<32x32xf32>
    %cst_12 = arith.constant dense<0.000000e+00> : vector<128x32xf32>
    %9 = tpu.matmul %2, %8, %cst_12 {dimension_numbers = #tpu.dot_dimension_numbers<[1], [0], [0], [1], [0, 0, 1, 1], [], []>} : vector<128x32xf32>, vector<32x32xf32>, vector<128x32xf32> -> vector<128x32xf32>
    %10 = arith.addf %7, %9 : vector<128x32xf32>
    %c0_13 = arith.constant 0 : index
    %c0_14 = arith.constant 0 : index
    %11 = vector.load %arg7[%c0_13, %c0_14] : memref<1x32xf32, #tpu.memory_space<vmem>>, vector<1x32xf32>
    %12 = vector.broadcast %11 : vector<1x32xf32> to vector<128x32xf32>
    %13 = arith.addf %10, %12 : vector<128x32xf32>
    %cst_15 = arith.constant 0.000000e+00 : f32
    %14 = vector.broadcast %cst_15 : f32 to vector<128x32xf32>
    %15 = arith.maximumf %13, %14 : vector<128x32xf32>
    %c0_16 = arith.constant 0 : index
    %c0_17 = arith.constant 0 : index
    %16 = vector.load %arg8[%c0_16, %c0_17] : memref<32x3xf32, #tpu.memory_space<vmem>>, vector<32x3xf32>
    %cst_18 = arith.constant dense<0.000000e+00> : vector<128x3xf32>
    %17 = tpu.matmul %15, %16, %cst_18 {dimension_numbers = #tpu.dot_dimension_numbers<[1], [0], [0], [1], [0, 0, 1, 1], [], []>} : vector<128x32xf32>, vector<32x3xf32>, vector<128x3xf32> -> vector<128x3xf32>
    %c0_19 = arith.constant 0 : index
    %c0_20 = arith.constant 0 : index
    %18 = vector.load %arg9[%c0_19, %c0_20] : memref<1x3xf32, #tpu.memory_space<vmem>>, vector<1x3xf32>
    %19 = vector.broadcast %18 : vector<1x3xf32> to vector<128x3xf32>
    %20 = arith.addf %17, %19 : vector<128x3xf32>
    %cst_21 = arith.constant dense<0xFF800000> : vector<128xf32>
    %21 = vector.multi_reduction <maximumf>, %20, %cst_21 [1] : vector<128x3xf32> to vector<128xf32>
    %22 = vector.shape_cast %21 : vector<128xf32> to vector<128x1xf32>
    %23 = vector.broadcast %22 : vector<128x1xf32> to vector<128x3xf32>
    %24 = arith.subf %20, %23 : vector<128x3xf32>
    %25 = math.exp %24 : vector<128x3xf32>
    %cst_22 = arith.constant dense<0.000000e+00> : vector<128xf32>
    %26 = vector.multi_reduction <add>, %25, %cst_22 [1] : vector<128x3xf32> to vector<128xf32>
    %27 = vector.shape_cast %26 : vector<128xf32> to vector<128x1xf32>
    %28 = tpu.reciprocal %27 : vector<128x1xf32> -> vector<128x1xf32>
    %29 = vector.broadcast %28 : vector<128x1xf32> to vector<128x3xf32>
    %30 = arith.mulf %25, %29 : vector<128x3xf32>
    %c0_23 = arith.constant 0 : index
    %c0_24 = arith.constant 0 : index
    %31 = vector.load %arg10[%c0_23, %c0_24] : memref<3x32xf32, #tpu.memory_space<vmem>>, vector<3x32xf32>
    %cst_25 = arith.constant dense<0.000000e+00> : vector<3x128xf32>
    %32 = tpu.matmul %31, %15, %cst_25 {dimension_numbers = #tpu.dot_dimension_numbers<[1], [1], [0], [0], [0, 0, 1, 0], [], []>} : vector<3x32xf32>, vector<128x32xf32>, vector<3x128xf32> -> vector<3x128xf32>
    %c0_26 = arith.constant 0 : index
    %c0_27 = arith.constant 0 : index
    %33 = vector.load %arg11[%c0_26, %c0_27] : memref<3x1xf32, #tpu.memory_space<vmem>>, vector<3x1xf32>
    %34 = vector.broadcast %33 : vector<3x1xf32> to vector<3x128xf32>
    %35 = arith.addf %32, %34 : vector<3x128xf32>
    %cst_28 = arith.constant dense<0xFF800000> : vector<128xf32>
    %36 = vector.multi_reduction <maximumf>, %35, %cst_28 [0] : vector<3x128xf32> to vector<128xf32>
    %37 = vector.shape_cast %36 : vector<128xf32> to vector<1x128xf32>
    %38 = vector.broadcast %37 : vector<1x128xf32> to vector<3x128xf32>
    %39 = arith.subf %35, %38 : vector<3x128xf32>
    %40 = math.exp %39 : vector<3x128xf32>
    %cst_29 = arith.constant dense<0.000000e+00> : vector<128xf32>
    %41 = vector.multi_reduction <add>, %40, %cst_29 [0] : vector<3x128xf32> to vector<128xf32>
    %42 = vector.shape_cast %41 : vector<128xf32> to vector<1x128xf32>
    %43 = tpu.reciprocal %42 : vector<1x128xf32> -> vector<1x128xf32>
    %44 = vector.broadcast %43 : vector<1x128xf32> to vector<3x128xf32>
    %45 = arith.mulf %40, %44 : vector<3x128xf32>
    %c0_30 = arith.constant 0 : index
    %c0_31 = arith.constant 0 : index
    %46 = vector.load %arg13[%c0_30, %c0_31] : memref<3x128xf32, #tpu.memory_space<vmem>>, vector<3x128xf32>
    tpu.vector_store %arg13[%c0_30, %c0_31], %45 {strides = array<i32>} : memref<3x128xf32, #tpu.memory_space<vmem>>, vector<3x128xf32>,
    %47 = vector.extract_strided_slice %30 {offsets = [0, 0], sizes = [128, 1], strides = [1, 1]} : vector<128x3xf32> to vector<128x1xf32>
    %48 = vector.broadcast %47 : vector<128x1xf32> to vector<128x32xf32>
    %49 = arith.mulf %48, %0 : vector<128x32xf32>
    %50 = vector.extract_strided_slice %30 {offsets = [0, 1], sizes = [128, 1], strides = [1, 1]} : vector<128x3xf32> to vector<128x1xf32>
    %51 = vector.broadcast %50 : vector<128x1xf32> to vector<128x32xf32>
    %52 = arith.mulf %51, %1 : vector<128x32xf32>
    %53 = arith.addf %49, %52 : vector<128x32xf32>
    %54 = vector.extract_strided_slice %30 {offsets = [0, 2], sizes = [128, 1], strides = [1, 1]} : vector<128x3xf32> to vector<128x1xf32>
    %55 = vector.broadcast %54 : vector<128x1xf32> to vector<128x32xf32>
    %56 = arith.mulf %55, %2 : vector<128x32xf32>
    %57 = arith.addf %53, %56 : vector<128x32xf32>
    %c0_32 = arith.constant 0 : index
    %c0_33 = arith.constant 0 : index
    %58 = vector.load %arg12[%c0_32, %c0_33] : memref<128x32xf32, #tpu.memory_space<vmem>>, vector<128x32xf32>
    tpu.vector_store %arg12[%c0_32, %c0_33], %57 {strides = array<i32>} : memref<128x32xf32, #tpu.memory_space<vmem>>, vector<128x32xf32>,
    return
  }
  func.func @transform_0(%arg0: i32) -> (i32, i32) {
    %c0_i32 = arith.constant 0 : i32
    %c0_i32_0 = arith.constant 0 : i32
    return %arg0, %c0_i32 : i32, i32
  }
  func.func @transform_1(%arg0: i32) -> (i32, i32) {
    %c0_i32 = arith.constant 0 : i32
    %c0_i32_0 = arith.constant 0 : i32
    return %arg0, %c0_i32 : i32, i32
  }
  func.func @transform_2(%arg0: i32) -> (i32, i32) {
    %c0_i32 = arith.constant 0 : i32
    %c0_i32_0 = arith.constant 0 : i32
    return %arg0, %c0_i32 : i32, i32
  }
  func.func @transform_3(%arg0: i32) -> (i32, i32) {
    %c0_i32 = arith.constant 0 : i32
    %c0_i32_0 = arith.constant 0 : i32
    %c0_i32_1 = arith.constant 0 : i32
    return %c0_i32, %c0_i32_0 : i32, i32
  }
  func.func @transform_4(%arg0: i32) -> (i32, i32) {
    %c0_i32 = arith.constant 0 : i32
    %c0_i32_0 = arith.constant 0 : i32
    %c0_i32_1 = arith.constant 0 : i32
    return %c0_i32, %c0_i32_0 : i32, i32
  }
  func.func @transform_5(%arg0: i32) -> (i32, i32) {
    %c0_i32 = arith.constant 0 : i32
    %c0_i32_0 = arith.constant 0 : i32
    %c0_i32_1 = arith.constant 0 : i32
    return %c0_i32, %c0_i32_0 : i32, i32
  }
  func.func @transform_6(%arg0: i32) -> (i32, i32) {
    %c0_i32 = arith.constant 0 : i32
    %c0_i32_0 = arith.constant 0 : i32
    %c0_i32_1 = arith.constant 0 : i32
    return %c0_i32, %c0_i32_0 : i32, i32
  }
  func.func @transform_7(%arg0: i32) -> (i32, i32) {
    %c0_i32 = arith.constant 0 : i32
    %c0_i32_0 = arith.constant 0 : i32
    %c0_i32_1 = arith.constant 0 : i32
    return %c0_i32, %c0_i32_0 : i32, i32
  }
  func.func @transform_8(%arg0: i32) -> (i32, i32) {
    %c0_i32 = arith.constant 0 : i32
    %c0_i32_0 = arith.constant 0 : i32
    %c0_i32_1 = arith.constant 0 : i32
    return %c0_i32, %c0_i32_0 : i32, i32
  }
  func.func @transform_9(%arg0: i32) -> (i32, i32) {
    %c0_i32 = arith.constant 0 : i32
    %c0_i32_0 = arith.constant 0 : i32
    %c0_i32_1 = arith.constant 0 : i32
    return %c0_i32, %c0_i32_0 : i32, i32
  }
  func.func @transform_10(%arg0: i32) -> (i32, i32) {
    %c0_i32 = arith.constant 0 : i32
    %c0_i32_0 = arith.constant 0 : i32
    %c0_i32_1 = arith.constant 0 : i32
    return %c0_i32, %c0_i32_0 : i32, i32
  }
  func.func @transform_11(%arg0: i32) -> (i32, i32) {
    %c0_i32 = arith.constant 0 : i32
    %c0_i32_0 = arith.constant 0 : i32
    return %arg0, %c0_i32 : i32, i32
  }
  func.func @transform_12(%arg0: i32) -> (i32, i32) {
    %c0_i32 = arith.constant 0 : i32
    %c0_i32_0 = arith.constant 0 : i32
    return %c0_i32, %arg0 : i32, i32
  }
}

</mosaic_0001>

<bundles_post_ra>
// kernel: tpu_custom_call.1
= control target key start
LH: loop header
LB: loop body
LE: loop exit
PB: predicated region body
PF: predicated region fallthrough
CT: control target
= control target key end

     0   :  { %s4059_s0 = inlined_call_operand.vmem [shape: f32[200,32], index: 0, kind: input, shape index: {}]   ;;  %s4060_s1 = inlined_call_operand.vmem [shape: f32[200,32], index: 1, kind: input, shape index: {}]   ;;  %s4061_s2 = inlined_call_operand.vmem [shape: f32[200,32], index: 2, kind: input, shape index: {}]   ;;  %s4062_s3 = inlined_call_operand.vmem [shape: f32[32,32], index: 3, kind: input, shape index: {}]   ;;  %s4063_s4 = inlined_call_operand.vmem [shape: f32[32,32], index: 4, kind: input, shape index: {}]   ;;  %s4064_s5 = inlined_call_operand.vmem [shape: f32[32,32], index: 5, kind: input, shape index: {}]   ;;  %s4065_s6 = inlined_call_operand.vmem [shape: f32[1,32], index: 6, kind: input, shape index: {}]   ;;  %s4066_s7 = inlined_call_operand.vmem [shape: f32[32,3], index: 7, kind: input, shape index: {}]   ;;  %s4067_s8 = inlined_call_operand.vmem [shape: f32[1,3], index: 8, kind: input, shape index: {}]   ;;  %s4068_s9 = inlined_call_operand.vmem [shape: f32[3,32], index: 9, kind: input, shape index: {}]   ;;  %s4069_s10 = inlined_call_operand.vmem [shape: f32[3,1], index: 10, kind: input, shape index: {}]   ;;  %s4070_s11 = inlined_call_operand.vmem [shape: f32[200,32], index: 11, kind: output, shape index: {0}]   ;;  %s4071_s12 = inlined_call_operand.hbm [shape: f32[3,200], index: 12, kind: output, shape index: {1}]  }
   0x1   :  { %4073 = sst [smem:[#allocation8_spill]] %s4059_s0 }
   0x2   :  { %4074 = sst [smem:[#allocation9_spill]] %s4060_s1 }
   0x3   :  { %4075 = sst [smem:[#allocation10_spill]] %s4061_s2 }
   0x4   :  { %4076 = sst [smem:[#allocation11_spill]] %s4062_s3 }
   0x5   :  { %4077 = sst [smem:[#allocation12_spill]] %s4063_s4 }
   0x6   :  { %4078 = sst [smem:[#allocation13_spill]] %s4064_s5 }
   0x7   :  { %4079 = sst [smem:[#allocation14_spill]] %s4065_s6 }
   0x8   :  { %18 = vsyncpa [#allocation4], 0 }
   0x9   :  { %20 = vsyncpa [#allocation4 + $0x1], 0  ;;  %s3309_s21 = smov 0   ;;  %s3311_s22 = smov 0  }
   0xa   :  { %s3313_s23 = smov 0   ;;  %s3315_s24 = smov 0  }
   0xb LB: > { %4080 = sst [smem:[#allocation6_spill]] %s3199_s23  ;;  %s3330_s25 = sadd.s32 4294967295, %s3203_s24   ;;  %s3203_s24 = sphi %s3315_s24, %s4101_s24   ;;  %s3199_s23 = sphi %s3313_s23, %s4098_s23   ;;  %s3195_s22 = sphi %s3311_s22, %s4100_s22   ;;  %s3191_s21 = sphi %s3309_s21, %s4099_s21  }
   0xc   : > { %s2360_s26 = sadd.s32 4294967294, %s3203_s24   ;;  %s3334_s27 = sadd.s32 1, %s3203_s24  }
   0xd   : > { %s279_s28 = sadd.s32 1, %s3199_s23  ;;  %s276_s29 = ssub.s32 %s3203_s24, %s3334_s27 }
   0xe   : > { %p289_p0 = scmp.ne.s32.totalorder %s3199_s23, %s3195_s22  ;;  %p277_p1 = scmp.eq.s32.totalorder %s276_s29, 0 }
   0xf   : > { %p290_p2 = scmp.eq.s32.totalorder %s3330_s25, 1  ;;  %p321_p3 = scmp.ne.s32.totalorder %s3195_s22, %s3191_s21 }
  0x10   : > { %p322_p4 = scmp.eq.s32.totalorder %s2360_s26, 1  ;;  %p2363_p7 = scmp.ge.s32.totalorder %s3203_s24, 1 }
  0x11   : > { %s3345_s30 = scalar_select %p277_p1, %s3199_s23, %s279_s28  }
  0x12   : > { %p3347_p5 = por %p290_p2, %p289_p0  ;;  %p3351_p6 = por %p322_p4, %p321_p3 }
  0x13   : > { %4081 = sst [smem:[#allocation7_spill]] %s3345_s30  ;;  %p415_p8 = scmp.lt.s32.totalorder %s3203_s24, 3 }
  0x15   : > { %p416_p9 = pnand %p2363_p7, %p415_p8 }
  0x16   : > { %s4084_s4 = sld [smem:[#allocation12_spill]] (!%p416_p9)  ;;  %s3367_s26 = sshll.u32 (!%p416_p9), %s3330_s25, 4  ;;  %v1225_v8 = vld [vmem:[%s4066_s7] sm:$0xff] (!%p416_p9)  ;;  %v1226_v9 = vld [vmem:[%s4066_s7 + $0x8] sm:$0xff] (!%p416_p9)  ;;  %vm586_vm0 = vcmask (!%p416_p9), 261120   ;;  %v1227_v24 = vld [vmem:[%s4066_s7 + $0x10] sm:$0xff] (!%p416_p9) }
  0x17   : > { %419 = sbr.rel (%p416_p9) target bundleno = 1184 (0x4a0), region = 64  ;;  %p488_p10 = scmp.lt.s32.totalorder (!%p416_p9), %s3367_s26, 24  ;;  %v2761_v13 = vpack.c.bf16 (!%p416_p9), %v1226_v9, %v1225_v8  ;;  %v1228_v25 = vld [vmem:[%s4066_s7 + $0x18] sm:$0xff] (!%p416_p9)  ;;  %v3237_v8 = vmov (!%p416_p9), 0.0|0.0   ;;  %v1607_v9 = vld [vmem:[%s4069_s10] sm:$0x7] (!%p416_p9)  ;;  %vm3550_vm1 = vmpackc.low (!%p416_p9), %vm586_vm0, %vm586_vm0 }
  0x18   : > { %s4085_s3 = sld [smem:[#allocation11_spill]] (!%p416_p9)  ;;  %s4086_s1 = sld [smem:[#allocation9_spill]] (!%p416_p9)  ;;  %v2765_v29 = vpack.c.bf16 (!%p416_p9), %v1228_v25, %v1227_v24  ;;  %vm3239_vm2 = vmmov (!%p416_p9), 0   ;;  %vm1429_vm3 = vcmask (!%p416_p9), 23552   ;;  %vm1686_vm4 = vcmask (!%p416_p9), 1042432  }
  0x19   : > { %s4087_s5 = sld [smem:[#allocation13_spill]] (!%p416_p9)  ;;  %s4088_s0 = sld [smem:[#allocation8_spill]] (!%p416_p9) }
  0x1a   : > { %s4089_s2 = sld [smem:[#allocation10_spill]] (!%p416_p9)  ;;  %s4090_s6 = sld [smem:[#allocation14_spill]] (!%p416_p9) }
  0x1b   : > { %s3615_s17 = sand.u32 (!%p416_p9), 1, %s3195_s22  }
  0x1c   : > { %v582_v0 = vld [vmem:[%s4084_s4] sm:$0xff] (!%p416_p9)  ;;  %v583_v1 = vld [vmem:[%s4084_s4 + $0x8] sm:$0xff] (!%p416_p9)  ;;  %v584_v2 = vld [vmem:[%s4084_s4 + $0x10] sm:$0xff] (!%p416_p9)  ;;  %s2364_s28 = sshll.u32 (!%p416_p9), %s3615_s17, 7 }
  0x1d   : > { %v2737_v3 = vpack.c.bf16 (!%p416_p9), %v583_v1, %v582_v0  ;;  %v585_v4 = vld [vmem:[%s4084_s4 + $0x18] sm:$0xff] (!%p416_p9)  ;;  %s2365_s4 = sshll.u32 (!%p416_p9), %s3615_s17, 2  ;;  %s3852_s29 = scalar_lea.vmem (!%p416_p9), [#allocation2], %s2364_s28  }
  0x1e   : > { %v2741_v5 = vpack.c.bf16 %v585_v4, %v584_v2  ;;  %v578_v6 = vld [vmem:[%s4085_s3] sm:$0xff]  ;;  %v579_v7 = vld [vmem:[%s4085_s3 + $0x8] sm:$0xff]  ;;  %s489_s19 = scalar_select %p488_p10, %s3367_s26, 24  ;;  %v580_v11 = vld [vmem:[%s4085_s3 + $0x10] sm:$0xff] }
  0x1f   : > { %2738 = vmatprep.subr.bf16.mxu0 %v2737_v3  ;;  %2801 = vmatprep.subr.bf16.mxu1 %v2737_v3  ;;  %v2745_v10 = vpack.c.bf16 %v579_v7, %v578_v6  ;;  %v581_v12 = vld [vmem:[%s4085_s3 + $0x18] sm:$0xff]  ;;  %v973_v18 = vld [vmem:[%s4087_s5] sm:$0xff]  ;;  %v974_v19 = vld [vmem:[%s4087_s5 + $0x8] sm:$0xff]  ;;  %s2474_s30 = sshll.u32 (%p3347_p5), %s3330_s25, 7 }
  0x20   : > { %2740 = vmatpush3.bf16.msra.mxu0 %v2737_v3  ;;  %2803 = vmatpush3.bf16.msra.mxu1 %v2737_v3  ;;  %s3386_s15 = sshll.u32 %s489_s19, 3  ;;  %v2749_v17 = vpack.c.bf16 %v581_v12, %v580_v11  ;;  %v2753_v22 = vpack.c.bf16 %v974_v19, %v973_v18  ;;  %v975_v37 = vld [vmem:[%s4087_s5 + $0x10] sm:$0xff]  ;;  %v976_v38 = vld [vmem:[%s4087_s5 + $0x18] sm:$0xff]  ;;  %s3685_s19 = scalar_lea.vmem [#allocation3], %s2365_s4 }
  0x21   : > { %2742 = vmatprep.subr.bf16.mxu0 %v2741_v5  ;;  %2802 = vmatprep.subr.bf16.mxu1 %v2741_v5  ;;  %s3392_s18 = scalar_lea.vmem %s4086_s1, %s3386_s15  ;;  %s3437_s23 = scalar_lea.vmem %s4088_s0, %s3386_s15  ;;  %v2757_v42 = vpack.c.bf16 %v976_v38, %v975_v37 }
  0x22   : > { %v546_v14 = vld [vmem:[%s3392_s18] sm:$0xff]  ;;  %v547_v15 = vld [vmem:[%s3392_s18 + $0x8] sm:$0xff]  ;;  %v548_v16 = vld [vmem:[%s3392_s18 + $0x10] sm:$0xff]  ;;  %s3488_s20 = scalar_lea.vmem %s4089_s2, %s3386_s15  ;;  %s3940_s4 = scalar_lea.vmem (%p3347_p5), %s4070_s11, %s2474_s30  }
  0x23   : > { %2582 = vmatprep.mubr.msk.f32.mxu0 %vm586_vm0, %v546_v14  ;;  %v549_v20 = vld [vmem:[%s3392_s18 + $0x18] sm:$0xff]  ;;  %v550_v21 = vld [vmem:[%s3392_s18 + $0x20] sm:$0xff]  ;;  %v551_v23 = vld [vmem:[%s3392_s18 + $0x28] sm:$0xff] }
  0x24   : > { %2744 = vmatpush3.bf16.msra.mxu0 %v2741_v5  ;;  %2804 = vmatpush3.bf16.msra.mxu1 %v2741_v5  ;;  %v552_v26 = vld [vmem:[%s3392_s18 + $0x30] sm:$0xff]  ;;  %v557_v28 = vld [vmem:[%s3392_s18 + $0x58] sm:$0xff]  ;;  %v558_v31 = vld [vmem:[%s3392_s18 + $0x60] sm:$0xff] }
  0x25   : > { %2746 = vmatprep.subr.bf16.mxu0 %v2745_v10  ;;  %2762 = vmatprep.subr.bf16.mxu1 %v2761_v13  ;;  %v556_v27 = vld [vmem:[%s3392_s18 + $0x50] sm:$0xff]  ;;  %v553_v30 = vld [vmem:[%s3392_s18 + $0x38] sm:$0xff]  ;;  %v554_v32 = vld [vmem:[%s3392_s18 + $0x40] sm:$0xff] }
  0x26   : > { %2597 = vmatprep.mubr.msk.f32.mxu1 %vm586_vm0, %v556_v27  ;;  %v559_v33 = vld [vmem:[%s3392_s18 + $0x68] sm:$0xff]  ;;  %v560_v34 = vld [vmem:[%s3392_s18 + $0x70] sm:$0xff]  ;;  %v530_v36 = vld [vmem:[%s3437_s23] sm:$0xff] }
  0x27   : > { %2583 = vmatmul.mubr.msk.f32.vlgmr.msra.gmra.mrb[0].mxu0 %vm586_vm0, %v547_v15  ;;  %2598 = vmatmul.mubr.msk.f32.vlgmr.msra.gmra.mrb[0].mxu1 %vm586_vm0, %v557_v28  ;;  %v555_v35 = vld [vmem:[%s3392_s18 + $0x48] sm:$0xff]  ;;  %v561_v39 = vld [vmem:[%s3392_s18 + $0x78] sm:$0xff]  ;;  %v532_v41 = vld [vmem:[%s3437_s23 + $0x10] sm:$0xff] }
  0x28   : > { %2748 = vmatpush3.bf16.msra.mxu0 %v2745_v10  ;;  %2585 = vmatprep.mubr.msk.f32.mxu0 %vm586_vm0, %v548_v16  ;;  %v531_v40 = vld [vmem:[%s3437_s23 + $0x8] sm:$0xff]  ;;  %v533_v43 = vld [vmem:[%s3437_s23 + $0x18] sm:$0xff]  ;;  %v534_v44 = vld [vmem:[%s3437_s23 + $0x20] sm:$0xff]  ;;  %v3238_v10 = vmov 0  }
  0x29   : > { %2750 = vmatprep.subr.bf16.mxu0 %v2749_v17  ;;  %2600 = vmatprep.mubr.msk.f32.mxu1 %vm586_vm0, %v558_v31  ;;  %v535_v45 = vld [vmem:[%s3437_s23 + $0x28] sm:$0xff]  ;;  %v536_v46 = vld [vmem:[%s3437_s23 + $0x30] sm:$0xff]  ;;  %v537_v47 = vld [vmem:[%s3437_s23 + $0x38] sm:$0xff] }
  0x2a   : > { %2764 = vmatpush3.bf16.msra.mxu1 %v2761_v13  ;;  %v538_v48 = vld [vmem:[%s3437_s23 + $0x40] sm:$0xff]  ;;  %v539_v49 = vld [vmem:[%s3437_s23 + $0x48] sm:$0xff]  ;;  %v540_v50 = vld [vmem:[%s3437_s23 + $0x50] sm:$0xff]  ;;  %2946 = vset.pattern.permute.xlu0 %v3238_v10 }
  0x2b   : > { %2586 = vmatmul.mubr.msk.f32.gmra.mrb[2].mxu0 %vm586_vm0, %v549_v20  ;;  %2766 = vmatprep.subr.bf16.mxu1 %v2765_v29  ;;  %v541_v51 = vld [vmem:[%s3437_s23 + $0x58] sm:$0xff]  ;;  %v542_v52 = vld [vmem:[%s3437_s23 + $0x60] sm:$0xff]  ;;  %v543_v53 = vld [vmem:[%s3437_s23 + $0x68] sm:$0xff] }
  0x2c   : > { %2588 = vmatprep.mubr.msk.f32.mxu0 %vm586_vm0, %v550_v21  ;;  %2752 = vmatpush3.bf16.msra.mxu0 %v2749_v17  ;;  %v544_v54 = vld [vmem:[%s3437_s23 + $0x70] sm:$0xff]  ;;  %v545_v55 = vld [vmem:[%s3437_s23 + $0x78] sm:$0xff]  ;;  %v562_v56 = vld [vmem:[%s3488_s20] sm:$0xff] }
  0x2d   : > { %2754 = vmatprep.subr.bf16.mxu0 %v2753_v22  ;;  %2601 = vmatmul.mubr.msk.f32.gmra.mrb[2].mxu1 %vm586_vm0, %v559_v33  ;;  %v563_v57 = vld [vmem:[%s3488_s20 + $0x8] sm:$0xff]  ;;  %v564_v58 = vld [vmem:[%s3488_s20 + $0x10] sm:$0xff]  ;;  %v565_v59 = vld [vmem:[%s3488_s20 + $0x18] sm:$0xff] }
  0x2e   : > { %2603 = vmatprep.mubr.msk.f32.mxu1 %vm586_vm0, %v560_v34  ;;  %2768 = vmatpush3.bf16.msra.mxu1 %v2765_v29  ;;  %v566_v60 = vld [vmem:[%s3488_s20 + $0x20] sm:$0xff]  ;;  %v567_v61 = vld [vmem:[%s3488_s20 + $0x28] sm:$0xff]  ;;  %v568_v62 = vld [vmem:[%s3488_s20 + $0x30] sm:$0xff] }
  0x2f   : > { %2589 = vmatmul.mubr.msk.f32.gmra.mrb[4].mxu0 %vm586_vm0, %v551_v23  ;;  %v569_v63 = vld [vmem:[%s3488_s20 + $0x38] sm:$0xff]  ;;  %v570_v0 = vld [vmem:[%s3488_s20 + $0x40] sm:$0xff]  ;;  %v571_v1 = vld [vmem:[%s3488_s20 + $0x48] sm:$0xff]  ;;  %2769 = vmatprep.subr.bf16.mxu1 %v3237_v8 }
  0x30   : > { %2591 = vmatprep.mubr.msk.f32.mxu0 %vm586_vm0, %v552_v26  ;;  %v572_v2 = vld [vmem:[%s3488_s20 + $0x50] sm:$0xff]  ;;  %v573_v3 = vld [vmem:[%s3488_s20 + $0x58] sm:$0xff]  ;;  %v574_v4 = vld [vmem:[%s3488_s20 + $0x60] sm:$0xff]  ;;  %2947 = vset.pattern.permute.xlu1 %v3238_v10 }
  0x31   : > { %2604 = vmatmul.mubr.msk.f32.gmra.mrb[4].mxu1 %vm586_vm0, %v561_v39  ;;  %v575_v5 = vld [vmem:[%s3488_s20 + $0x68] sm:$0xff]  ;;  %v576_v6 = vld [vmem:[%s3488_s20 + $0x70] sm:$0xff]  ;;  %v577_v7 = vld [vmem:[%s3488_s20 + $0x78] sm:$0xff]  ;;  %1610 = vperm.xlu0 %2946, %v1607_v9  }
  0x32   : > { %v3543_v17 = vld [vmem:[%s4090_s6] ss:$0 sm:$0xff] }
  0x33   : > { %2592 = vmatmul.mubr.msk.f32.gmra.mrb[6].mxu0 %vm586_vm0, %v553_v30 }
  0x34   : > { %2594 = vmatprep.mubr.msk.f32.mxu0 %vm586_vm0, %v554_v32 }
  0x37   : > { %2595 = vmatmul.mubr.msk.f32.gmra.mrb[8].mxu0 %vm586_vm0, %v555_v35 }
  0x38   : > { %2614 = vmatprep.mubr.msk.f32.mxu0 %vm586_vm0, %v530_v36 }
  0x3b   : > { %2615 = vmatmul.mubr.msk.f32.vlgmr.msra.gmra.mrb[0].mxu0 %vm586_vm0, %v531_v40 }
  0x3c   : > { %2756 = vmatpush3.bf16.msra.mxu0 %v2753_v22  ;;  %2617 = vmatprep.mubr.msk.f32.mxu0 %vm586_vm0, %v532_v41 }
  0x3d   : > { %2758 = vmatprep.subr.bf16.mxu0 %v2757_v42 }
  0x3f   : > { %2618 = vmatmul.mubr.msk.f32.gmra.mrb[2].mxu0 %vm586_vm0, %v533_v43 }
  0x40   : > { %2620 = vmatprep.mubr.msk.f32.mxu0 %vm586_vm0, %v534_v44  ;;  %2760 = vmatpush3.bf16.msra.mxu0 %v2757_v42 }
  0x43   : > { %2621 = vmatmul.mubr.msk.f32.gmra.mrb[4].mxu0 %vm586_vm0, %v535_v45 }
  0x44   : > { %2623 = vmatprep.mubr.msk.f32.mxu0 %vm586_vm0, %v536_v46 }
  0x47   : > { %2624 = vmatmul.mubr.msk.f32.gmra.mrb[6].mxu0 %vm586_vm0, %v537_v47 }
  0x48   : > { %2626 = vmatprep.mubr.msk.f32.mxu0 %vm586_vm0, %v538_v48 }
  0x4b   : > { %2627 = vmatmul.mubr.msk.f32.gmra.mrb[8].mxu0 %vm586_vm0, %v539_v49 }
  0x4c   : > { %2629 = vmatprep.mubr.msk.f32.mxu0 %vm586_vm0, %v540_v50 }
  0x4f   : > { %2630 = vmatmul.mubr.msk.f32.gmra.mrb[10].mxu0 %vm586_vm0, %v541_v51 }
  0x50   : > { %2632 = vmatprep.mubr.msk.f32.mxu0 %vm586_vm0, %v542_v52 }
  0x53   : > { %2633 = vmatmul.mubr.msk.f32.gmra.mrb[12].mxu0 %vm586_vm0, %v543_v53 }
  0x54   : > { %2635 = vmatprep.mubr.msk.f32.mxu0 %vm586_vm0, %v544_v54 }
  0x57   : > { %2636 = vmatmul.mubr.msk.f32.gmra.mrb[14].mxu0 %vm586_vm0, %v545_v55 }
  0x58   : > { %2646 = vmatprep.mubr.msk.f32.mxu0 %vm586_vm0, %v562_v56 }
  0x5b   : > { %2647 = vmatmul.mubr.msk.f32.vlgmr.msra.gmra.mrb[0].mxu0 %vm586_vm0, %v563_v57 }
  0x5c   : > { %2649 = vmatprep.mubr.msk.f32.mxu0 %vm586_vm0, %v564_v58 }
  0x5f   : > { %2650 = vmatmul.mubr.msk.f32.gmra.mrb[2].mxu0 %vm586_vm0, %v565_v59 }
  0x60   : > { %2652 = vmatprep.mubr.msk.f32.mxu0 %vm586_vm0, %v566_v60 }
  0x63   : > { %2653 = vmatmul.mubr.msk.f32.gmra.mrb[4].mxu0 %vm586_vm0, %v567_v61 }
  0x64   : > { %2655 = vmatprep.mubr.msk.f32.mxu0 %vm586_vm0, %v568_v62 }
  0x67   : > { %2656 = vmatmul.mubr.msk.f32.gmra.mrb[6].mxu0 %vm586_vm0, %v569_v63 }
  0x68   : > { %2658 = vmatprep.mubr.msk.f32.mxu0 %vm586_vm0, %v570_v0 }
  0x6b   : > { %2659 = vmatmul.mubr.msk.f32.gmra.mrb[8].mxu0 %vm586_vm0, %v571_v1 }
  0x6c   : > { %2661 = vmatprep.mubr.msk.f32.mxu0 %vm586_vm0, %v572_v2 }
  0x6f   : > { %2662 = vmatmul.mubr.msk.f32.gmra.mrb[10].mxu0 %vm586_vm0, %v573_v3 }
  0x70   : > { %2664 = vmatprep.mubr.msk.f32.mxu0 %vm586_vm0, %v574_v4 }
  0x73   : > { %2665 = vmatmul.mubr.msk.f32.gmra.mrb[12].mxu0 %vm586_vm0, %v575_v5 }
  0x74   : > { %2667 = vmatprep.mubr.msk.f32.mxu0 %vm586_vm0, %v576_v6 }
  0x77   : > { %2668 = vmatmul.mubr.msk.f32.gmra.mrb[14].mxu0 %vm586_vm0, %v577_v7 }
  0xfa   : > { %v2599_v11 = vpop.f32.mrb[0].mxu1 }
  0xfb   : > { %v751_v12 = vpop.f32.mrb[1].mxu1 }
 0x100   : > { %v3532_v13 = vpop.f32.mrb[2].mxu1 }
 0x101   : > { %v3534_v14 = vpop.f32.mrb[3].mxu1 }
 0x104   : > { %v3536_v15 = vpop.f32.mrb[4].mxu1 }
 0x105   : > { %v3538_v16 = vpop.f32.mrb[5].mxu1 }
 0x12e   : > { %v2648_v18 = vpop.f32.mrb[0].mxu0 }
 0x12f   : > { %v1194_v19 = vadd.f32 %v2648_v18, %v3543_v17  ;;  %v1091_v20 = vpop.f32.mrb[1].mxu0 }
 0x130   : > { %v1193_v21 = vadd.f32 %v3543_v17, %v1091_v20 }
 0x131   : > { %v1210_v22 = vmax.f32 %v1194_v19, 0.0 }
 0x132   : > { %v1209_v23 = vmax.f32 %v1193_v21, 0.0  ;;  %v2651_v24 = vpop.f32.mrb[2].mxu0  ;;  %v2421_v21 = vld [vmem:[%s4067_s8] ss:$0 sm:$0xff] }
 0x133   : > { %v1196_v25 = vadd.f32 %v2651_v24, %v3543_v17  ;;  %v1101_v26 = vpop.f32.mrb[3].mxu0 }
 0x134   : > { %v2770_v28 = vpack.c.bf16 %v1210_v22, %v1209_v23  ;;  %v1195_v29 = vadd.f32 %v3543_v17, %v1101_v26  ;;  %2678 = vmatprep.mubr.msk.f32.mxu1 %vm586_vm0, %v1209_v23 }
 0x135   : > { %v1212_v30 = vmax.f32 %v1196_v25, 0.0  ;;  %2679 = vmatmul.mubr.msk.f32.vlgmr.msra.gmra.mrb[6].mxu1 %vm586_vm0, %v1210_v22 }
 0x136   : > { %v1211_v31 = vmax.f32 %v1195_v29, 0.0  ;;  %v2654_v32 = vpop.f32.mrb[4].mxu0  ;;  %2772 = vmatpush3.bf16.xpose.msk.msra.mxu1 %vm3550_vm1, %v2770_v28 }
 0x137   : > { %v1198_v33 = vadd.f32 %v2654_v32, %v3543_v17  ;;  %v1111_v34 = vpop.f32.mrb[5].mxu0  ;;  %2773 = vmatprep.subr.bf16.mxu1 %v3237_v8 }
 0x138   : > { %v2774_v35 = vpack.c.bf16 %v1212_v30, %v1211_v31  ;;  %v1197_v36 = vadd.f32 %v3543_v17, %v1111_v34  ;;  %2681 = vmatprep.mubr.msk.f32.mxu1 %vm586_vm0, %v1211_v31 }
 0x139   : > { %v1214_v37 = vmax.f32 %v1198_v33, 0.0  ;;  %2682 = vmatmul.mubr.msk.f32.gmra.mrb[8].mxu1 %vm586_vm0, %v1212_v30 }
 0x13a   : > { %v1213_v38 = vmax.f32 %v1197_v36, 0.0  ;;  %v2657_v39 = vpop.f32.mrb[6].mxu0 }
 0x13b   : > { %v1200_v40 = vadd.f32 %v2657_v39, %v3543_v17  ;;  %v1121_v41 = vpop.f32.mrb[7].mxu0 }
 0x13c   : > { %v2778_v42 = vpack.c.bf16 %v1214_v37, %v1213_v38  ;;  %v1199_v43 = vadd.f32 %v3543_v17, %v1121_v41  ;;  %2684 = vmatprep.mubr.msk.f32.mxu1 %vm586_vm0, %v1213_v38 }
 0x13d   : > { %v1216_v44 = vmax.f32 %v1200_v40, 0.0  ;;  %2685 = vmatmul.mubr.msk.f32.gmra.mrb[10].mxu1 %vm586_vm0, %v1214_v37 }
 0x13e   : > { %v1215_v45 = vmax.f32 %v1199_v43, 0.0  ;;  %v2660_v46 = vpop.f32.mrb[8].mxu0  ;;  %2776 = vmatpush3.bf16.xpose.msk.msra.mxu1 %vm3550_vm1, %v2774_v35 }
 0x13f   : > { %v1202_v47 = vadd.f32 %v2660_v46, %v3543_v17  ;;  %v1131_v48 = vpop.f32.mrb[9].mxu0  ;;  %2777 = vmatprep.subr.bf16.mxu1 %v3237_v8 }
 0x140   : > { %v2782_v49 = vpack.c.bf16 %v1216_v44, %v1215_v45  ;;  %v1201_v50 = vadd.f32 %v3543_v17, %v1131_v48  ;;  %2687 = vmatprep.mubr.msk.f32.mxu1 %vm586_vm0, %v1215_v45 }
 0x141   : > { %v1218_v51 = vmax.f32 %v1202_v47, 0.0  ;;  %2688 = vmatmul.mubr.msk.f32.gmra.mrb[12].mxu1 %vm586_vm0, %v1216_v44 }
 0x142   : > { %v1217_v52 = vmax.f32 %v1201_v50, 0.0  ;;  %v2663_v53 = vpop.f32.mrb[10].mxu0 }
 0x143   : > { %v2805_v54 = vadd.f32 %v2663_v53, %v2599_v11  ;;  %v1141_v55 = vpop.f32.mrb[11].mxu0 }
 0x144   : > { %v2786_v56 = vpack.c.bf16 %v1218_v51, %v1217_v52  ;;  %v2806_v57 = vadd.f32 %v1141_v55, %v751_v12  ;;  %2690 = vmatprep.mubr.msk.f32.mxu1 %vm586_vm0, %v1217_v52 }
 0x145   : > { %v1204_v58 = vadd.f32 %v2805_v54, %v3543_v17  ;;  %2691 = vmatmul.mubr.msk.f32.gmra.mrb[14].mxu1 %vm586_vm0, %v1218_v51 }
 0x146   : > { %v1203_v59 = vadd.f32 %v2806_v57, %v3543_v17  ;;  %v2666_v60 = vpop.f32.mrb[12].mxu0  ;;  %2780 = vmatpush3.bf16.xpose.msk.msra.mxu1 %vm3550_vm1, %v2778_v42 }
 0x147   : > { %v1220_v61 = vmax.f32 %v1204_v58, 0.0  ;;  %v2807_v62 = vadd.f32 %v2666_v60, %v3532_v13  ;;  %v1151_v63 = vpop.f32.mrb[13].mxu0  ;;  %2781 = vmatprep.subr.bf16.mxu1 %v3237_v8 }
 0x148   : > { %v1219_v0 = vmax.f32 %v1203_v59, 0.0  ;;  %v2808_v1 = vadd.f32 %v1151_v63, %v3534_v14 }
 0x149   : > { %v1206_v2 = vadd.f32 %v2807_v62, %v3543_v17 }
 0x14a   : > { %v2790_v3 = vpack.c.bf16 %v1220_v61, %v1219_v0  ;;  %v1205_v4 = vadd.f32 %v2808_v1, %v3543_v17  ;;  %v2669_v5 = vpop.f32.mrb[14].mxu0  ;;  %2693 = vmatprep.mubr.msk.f32.mxu1 %vm586_vm0, %v1219_v0 }
 0x14b   : > { %v1222_v6 = vmax.f32 %v1206_v2, 0.0  ;;  %v2809_v7 = vadd.f32 %v2669_v5, %v3536_v15  ;;  %v1161_v9 = vpop.f32.mrb[15].mxu0  ;;  %2694 = vmatmul.mubr.msk.f32.gmra.mrb[16].mxu1 %vm586_vm0, %v1220_v61  ;;  %v1611_v5 = vpop.permute.xlu0 %1610 }
 0x14c   : > { %v1221_v11 = vmax.f32 %v1205_v4, 0.0  ;;  %v2810_v12 = vadd.f32 %v1161_v9, %v3538_v16  ;;  %v3240_v16 = vmov 0.0  }
 0x14d   : > { %v1208_v13 = vadd.f32 %v2809_v7, %v3543_v17 }
 0x14e   : > { %v2794_v14 = vpack.c.bf16 %v1222_v6, %v1221_v11  ;;  %v1207_v18 = vadd.f32 %v2810_v12, %v3543_v17  ;;  %2696 = vmatprep.mubr.msk.f32.mxu1 %vm586_vm0, %v1221_v11  ;;  %2784 = vmatpush3.bf16.xpose.msk.msra.mxu1 %vm3550_vm1, %v2782_v49  ;;  %v1606_v17 = vld [vmem:[%s4068_s9] sm:$0x7] }
 0x14f   : > { %v1224_v19 = vmax.f32 %v1208_v13, 0.0  ;;  %2697 = vmatmul.mubr.msk.f32.gmra.mrb[18].mxu1 %vm586_vm0, %v1222_v6  ;;  %2785 = vmatprep.subr.bf16.mxu1 %v3237_v8 }
 0x150   : > { %v1223_v15 = vmax.f32 %v1207_v18, 0.0 }
 0x152   : > { %v2798_v20 = vpack.c.bf16 %v1224_v19, %v1223_v15  ;;  %2699 = vmatprep.mubr.msk.f32.mxu1 %vm586_vm0, %v1223_v15 }
 0x153   : > { %2700 = vmatmul.mubr.msk.f32.gmra.mrb[20].mxu1 %vm586_vm0, %v1224_v19 }
 0x154   : > { %2734 = vmatprep.mubr.msk.f32.mxu1 %vm3239_vm2, %v3240_v16 }
 0x156   : > { %2788 = vmatpush3.bf16.xpose.msk.msra.mxu1 %vm3550_vm1, %v2786_v56 }
 0x157   : > { %2789 = vmatprep.subr.bf16.mxu1 %v3237_v8 }
 0x15e   : > { %2792 = vmatpush3.bf16.xpose.msk.msra.mxu1 %vm3550_vm1, %v2790_v3 }
 0x15f   : > { %2793 = vmatprep.subr.bf16.mxu1 %v3237_v8 }
 0x166   : > { %2796 = vmatpush3.bf16.xpose.msk.msra.mxu1 %vm3550_vm1, %v2794_v14 }
 0x167   : > { %2797 = vmatprep.subr.bf16.mxu1 %v3237_v8 }
 0x16e   : > { %2800 = vmatpush3.bf16.xpose.msk.msra.mxu1 %vm3550_vm1, %v2798_v20 }
 0x175   : > { %2735 = vmatmul.mubr.msk.f32.vlgmr.msra.gmra.mrb[22].mxu1 %vm586_vm0, %v1606_v17 }
 0x208   : > { %v2680_v22 = vpop.f32.mrb[6].mxu1 }
 0x209   : > { %v3620_v23 = vadd.f32 %v2680_v22, %v2421_v21  ;;  %v1350_v8 = vpop.f32.mrb[7].mxu1 }
 0x20a   : > { %v3622_v24 = vadd.f32 %v2421_v21, %v1350_v8 }
 0x20b   : > { %v1433_v25 = vsel %vm1429_vm3, %v3620_v23, -inf }
 0x20c   : > { %1434 = vmax.xlane.f32.xlu0 %v1433_v25  ;;  %v2683_v26 = vpop.f32.mrb[8].mxu1  ;;  %v1430_v30 = vsel %vm1429_vm3, %v3622_v24, -inf }
 0x20d   : > { %v3626_v27 = vadd.f32 %v2683_v26, %v2421_v21  ;;  %v1360_v28 = vpop.f32.mrb[9].mxu1 }
 0x20e   : > { %v3628_v29 = vadd.f32 %v2421_v21, %v1360_v28 }
 0x20f   : > { %v1439_v31 = vsel %vm1429_vm3, %v3626_v27, -inf }
 0x210   : > { %1431 = vmax.xlane.f32.xlu0 %v1430_v30  ;;  %1440 = vmax.xlane.f32.xlu1 %v1439_v31  ;;  %v2686_v32 = vpop.f32.mrb[10].mxu1  ;;  %v1436_v36 = vsel %vm1429_vm3, %v3628_v29, -inf }
 0x211   : > { %v1370_v33 = vpop.f32.mrb[11].mxu1  ;;  %v3636_v35 = vadd.f32 %v2686_v32, %v2421_v21 }
 0x212   : > { %v3634_v34 = vadd.f32 %v2421_v21, %v1370_v33 }
 0x213   : > { %v1445_v42 = vsel %vm1429_vm3, %v3636_v35, -inf }
 0x214   : > { %1437 = vmax.xlane.f32.xlu1 %v1436_v36  ;;  %v2689_v37 = vpop.f32.mrb[12].mxu1  ;;  %v1442_v38 = vsel %vm1429_vm3, %v3634_v34, -inf }
 0x215   : > { %1443 = vmax.xlane.f32.xlu0 %v1442_v38  ;;  %v1380_v39 = vpop.f32.mrb[13].mxu1  ;;  %v3644_v41 = vadd.f32 %v2689_v37, %v2421_v21 }
 0x216   : > { %v3642_v40 = vadd.f32 %v2421_v21, %v1380_v39 }
 0x217   : > { %v1451_v48 = vsel %vm1429_vm3, %v3644_v41, -inf }
 0x218   : > { %1446 = vmax.xlane.f32.xlu1 %v1445_v42  ;;  %v2692_v43 = vpop.f32.mrb[14].mxu1  ;;  %v1448_v44 = vsel %vm1429_vm3, %v3642_v40, -inf }
 0x219   : > { %1449 = vmax.xlane.f32.xlu0 %v1448_v44  ;;  %v1390_v45 = vpop.f32.mrb[15].mxu1  ;;  %v3652_v47 = vadd.f32 %v2692_v43, %v2421_v21 }
 0x21a   : > { %v3650_v46 = vadd.f32 %v2421_v21, %v1390_v45 }
 0x21b   : > { %v1457_v53 = vsel %vm1429_vm3, %v3652_v47, -inf }
 0x21c   : > { %1452 = vmax.xlane.f32.xlu1 %v1451_v48  ;;  %v1454_v49 = vsel %vm1429_vm3, %v3650_v46, -inf }
 0x21d   : > { %1455 = vmax.xlane.f32.xlu0 %v1454_v49 }
 0x21e   : > { %v2695_v50 = vpop.f32.mrb[16].mxu1 }
 0x21f   : > { %v3658_v51 = vadd.f32 %v2695_v50, %v2421_v21  ;;  %v1400_v52 = vpop.f32.mrb[17].mxu1 }
 0x220   : > { %v3662_v54 = vadd.f32 %v2421_v21, %v1400_v52  ;;  %1458 = vmax.xlane.f32.xlu1 %v1457_v53 }
 0x221   : > { %v1463_v59 = vsel %vm1429_vm3, %v3658_v51, -inf }
 0x222   : > { %v2698_v55 = vpop.f32.mrb[18].mxu1  ;;  %v1460_v56 = vsel %vm1429_vm3, %v3662_v54, -inf }
 0x223   : > { %v3666_v57 = vadd.f32 %v2698_v55, %v2421_v21  ;;  %1461 = vmax.xlane.f32.xlu0 %v1460_v56  ;;  %v1410_v58 = vpop.f32.mrb[19].mxu1 }
 0x224   : > { %v3670_v60 = vadd.f32 %v2421_v21, %v1410_v58  ;;  %1464 = vmax.xlane.f32.xlu1 %v1463_v59 }
 0x225   : > { %v1469_v1 = vsel %vm1429_vm3, %v3666_v57, -inf }
 0x226   : > { %v2701_v61 = vpop.f32.mrb[20].mxu1  ;;  %v1466_v62 = vsel %vm1429_vm3, %v3670_v60, -inf }
 0x227   : > { %v3674_v63 = vadd.f32 %v2701_v61, %v2421_v21  ;;  %1467 = vmax.xlane.f32.xlu0 %v1466_v62  ;;  %v1420_v0 = vpop.f32.mrb[21].mxu1 }
 0x228   : > { %v3678_v2 = vadd.f32 %v2421_v21, %v1420_v0  ;;  %1470 = vmax.xlane.f32.xlu1 %v1469_v1 }
 0x229   : > { %v1475_v4 = vsel %vm1429_vm3, %v3674_v63, -inf }
 0x22a   : > { %v1472_v3 = vsel %vm1429_vm3, %v3678_v2, -inf }
 0x22b   : > { %1473 = vmax.xlane.f32.xlu0 %v1472_v3 }
 0x22c   : > { %1476 = vmax.xlane.f32.xlu1 %v1475_v4 }
 0x248   : > { %v1682_v6 = vpop.f32.mrb[22].mxu1 }
 0x249   : > { %v1683_v7 = vadd.f32 %v1682_v6, %v1611_v5  ;;  %v2736_v9 = vpop.f32.mrb[23].mxu1 }
 0x24b   : > { %v1687_v11 = vsel %vm1686_vm4, %v1683_v7, -inf }
 0x24c   : > { %v1688_v12 = vrot.slane %v1687_v11, 4 }
 0x24e   : > { %v1689_v13 = vmax.f32 %v1687_v11, %v1688_v12 }
 0x250   : > { %v1690_v14 = vrot.slane %v1689_v13, 2 }
 0x252   : > { %v1691_v18 = vmax.f32 %v1689_v13, %v1690_v14 }
 0x254   : > { %v1692_v19 = vrot.slane %v1691_v18, 1 }
 0x256   : > { %v1693_v15 = vmax.f32 %v1691_v18, %v1692_v19 }
 0x258   : > { %v1694_v20 = vsub.f32 %v1683_v7, %v1693_v15 }
 0x25a   : > { %v1695_v16 = vmul.f32 1.442695, %v1694_v20 }
 0x25c   : > { %2993 = vpow2.f32 %v1695_v16 }
 0x266   : > { %v2994_v17 = vpop.eup %2993 }
 0x267   : > { %v1697_v21 = vsel %vm1686_vm4, %v2994_v17, 0.0 }
 0x268   : > { %v1698_v22 = vrot.slane %v1697_v21, 4 }
 0x26a   : > { %v1699_v8 = vadd.f32 %v1698_v22, %v1697_v21 }
 0x26c   : > { %v1700_v25 = vrot.slane %v1699_v8, 2 }
 0x26e   : > { %v1701_v26 = vadd.f32 %v1700_v25, %v1699_v8 }
 0x270   : > { %v1702_v28 = vrot.slane %v1701_v26, 1 }
 0x272   : > { %v1703_v30 = vadd.f32 %v1702_v28, %v1701_v26 }
 0x274   : > { %2995 = vrcp.f32 %v1703_v30 }
 0x27e   : > { %v2996_v31 = vpop.eup %2995 }
 0x27f   : > { %v1705_v32 = vmul.f32 %v2996_v31, %v2994_v17 }
 0x281   : > { %1706 = vst [vmem:[%s3685_s19] sm:$0x7] %v1705_v32 }
 0x299   : > { %v1435_v33 = vpop.xlane.xlu0 %1434 }
 0x29a   : > { %v1479_v36 = vsub.f32 %v3620_v23, %v1435_v33 }
 0x29c   : > { %v1496_v37 = vmul.f32 1.442695, %v1479_v36 }
 0x29d   : > { %v1432_v38 = vpop.xlane.xlu0 %1431  ;;  %v1441_v39 = vpop.xlane.xlu1 %1440 }
 0x29e   : > { %2997 = vpow2.f32 %v1496_v37  ;;  %v1478_v42 = vsub.f32 %v3622_v24, %v1432_v38  ;;  %v1481_v43 = vsub.f32 %v3626_v27, %v1441_v39 }
 0x2a0   : > { %v1494_v44 = vmul.f32 1.442695, %v1478_v42  ;;  %v1500_v45 = vmul.f32 1.442695, %v1481_v43 }
 0x2a1   : > { %v1438_v48 = vpop.xlane.xlu1 %1437 }
 0x2a2   : > { %2999 = vpow2.f32 %v1494_v44  ;;  %v1480_v49 = vsub.f32 %v3628_v29, %v1438_v48  ;;  %v1444_v50 = vpop.xlane.xlu0 %1443 }
 0x2a3   : > { %3001 = vpow2.f32 %v1500_v45  ;;  %v1482_v52 = vsub.f32 %v3634_v34, %v1444_v50 }
 0x2a4   : > { %v1498_v53 = vmul.f32 1.442695, %v1480_v49 }
 0x2a5   : > { %v1502_v23 = vmul.f32 1.442695, %v1482_v52  ;;  %v1447_v55 = vpop.xlane.xlu1 %1446 }
 0x2a6   : > { %3003 = vpow2.f32 %v1498_v53  ;;  %v1483_v56 = vsub.f32 %v3636_v35, %v1447_v55  ;;  %v1450_v58 = vpop.xlane.xlu0 %1449  ;;  %v3241_v53 = vmov 2  }
 0x2a7   : > { %v1484_v24 = vsub.f32 %v3642_v40, %v1450_v58  ;;  %3005 = vpow2.f32 %v1502_v23  ;;  %2949 = vset.pattern.permute.xlu0 %v3241_v53 }
 0x2a8   : > { %v3695_v27 = vpop.eup %2997  ;;  %v1504_v59 = vmul.f32 1.442695, %v1483_v56 }
 0x2a9   : > { %v1506_v61 = vmul.f32 1.442695, %v1484_v24  ;;  %v1453_v62 = vpop.xlane.xlu1 %1452  ;;  %v1529_v29 = vsel %vm1429_vm3, %v3695_v27, 0.0 }
 0x2aa   : > { %3007 = vpow2.f32 %v1504_v59  ;;  %v1485_v34 = vsub.f32 %v3644_v41, %v1453_v62  ;;  %v1456_v0 = vpop.xlane.xlu0 %1455  ;;  %1530 = vadd.xlane.f32.xlu1 %v1529_v29 }
 0x2ab   : > { %v1486_v1 = vsub.f32 %v3650_v46, %v1456_v0  ;;  %3009 = vpow2.f32 %v1506_v61 }
 0x2ac   : > { %v3701_v35 = vpop.eup %2999  ;;  %v1508_v40 = vmul.f32 1.442695, %v1485_v34 }
 0x2ad   : > { %v3703_v3 = vpop.eup %3001  ;;  %v1510_v4 = vmul.f32 1.442695, %v1486_v1  ;;  %v1459_v5 = vpop.xlane.xlu1 %1458  ;;  %v1526_v6 = vsel %vm1429_vm3, %v3701_v35, 0.0 }
 0x2ae   : > { %3011 = vpow2.f32 %v1508_v40  ;;  %v1487_v7 = vsub.f32 %v3652_v47, %v1459_v5  ;;  %v1535_v41 = vsel %vm1429_vm3, %v3703_v3, 0.0  ;;  %1527 = vadd.xlane.f32.xlu0 %v1526_v6  ;;  %v3242_v6 = vmov 1  }
 0x2af   : > { %1536 = vadd.xlane.f32.xlu1 %v1535_v41  ;;  %3013 = vpow2.f32 %v1510_v4 }
 0x2b0   : > { %v3710_v46 = vpop.eup %3003  ;;  %v1512_v9 = vmul.f32 1.442695, %v1487_v7  ;;  %v1462_v11 = vpop.xlane.xlu0 %1461 }
 0x2b1   : > { %v1488_v12 = vsub.f32 %v3662_v54, %v1462_v11  ;;  %v1465_v13 = vpop.xlane.xlu1 %1464  ;;  %v1532_v14 = vsel %vm1429_vm3, %v3710_v46, 0.0  ;;  %v3715_v18 = vpop.eup %3005 }
 0x2b2   : > { %3015 = vpow2.f32 %v1512_v9  ;;  %v1489_v47 = vsub.f32 %v3658_v51, %v1465_v13  ;;  %1533 = vadd.xlane.f32.xlu0 %v1532_v14  ;;  %v1538_v22 = vsel %vm1429_vm3, %v3715_v18, 0.0 }
 0x2b3   : > { %v1514_v19 = vmul.f32 1.442695, %v1488_v12 }
 0x2b4   : > { %v3718_v15 = vpop.eup %3007  ;;  %v1516_v20 = vmul.f32 1.442695, %v1489_v47  ;;  %v1468_v16 = vpop.xlane.xlu0 %1467 }
 0x2b5   : > { %3017 = vpow2.f32 %v1514_v19  ;;  %v1490_v17 = vsub.f32 %v3670_v60, %v1468_v16  ;;  %v1471_v21 = vpop.xlane.xlu1 %1470  ;;  %v1541_v54 = vsel %vm1429_vm3, %v3718_v15, 0.0  ;;  %v3725_v8 = vpop.eup %3009 }
 0x2b6   : > { %3019 = vpow2.f32 %v1516_v20  ;;  %v1491_v51 = vsub.f32 %v3666_v57, %v1471_v21  ;;  %1542 = vadd.xlane.f32.xlu1 %v1541_v54  ;;  %1539 = vadd.xlane.f32.xlu0 %v1538_v22  ;;  %v1544_v33 = vsel %vm1429_vm3, %v3725_v8, 0.0 }
 0x2b7   : > { %v1518_v25 = vmul.f32 1.442695, %v1490_v17 }
 0x2b8   : > { %v3728_v26 = vpop.eup %3011  ;;  %v1520_v28 = vmul.f32 1.442695, %v1491_v51  ;;  %v1474_v30 = vpop.xlane.xlu0 %1473 }
 0x2b9   : > { %3021 = vpow2.f32 %v1518_v25  ;;  %v1492_v60 = vsub.f32 %v3678_v2, %v1474_v30  ;;  %v1477_v31 = vpop.xlane.xlu1 %1476  ;;  %v1547_v32 = vsel %vm1429_vm3, %v3728_v26, 0.0  ;;  %v3735_v36 = vpop.eup %3013 }
 0x2ba   : > { %3023 = vpow2.f32 %v1520_v28  ;;  %v1493_v57 = vsub.f32 %v3674_v63, %v1477_v31  ;;  %1548 = vadd.xlane.f32.xlu1 %v1547_v32  ;;  %1545 = vadd.xlane.f32.xlu0 %v1544_v33  ;;  %v1550_v42 = vsel %vm1429_vm3, %v3735_v36, 0.0 }
 0x2bb   : > { %v1522_v37 = vmul.f32 1.442695, %v1492_v60 }
 0x2bc   : > { %v3738_v38 = vpop.eup %3015  ;;  %v1524_v39 = vmul.f32 1.442695, %v1493_v57 }
 0x2bd   : > { %3025 = vpow2.f32 %v1522_v37  ;;  %v1553_v2 = vsel %vm1429_vm3, %v3738_v38, 0.0 }
 0x2be   : > { %3027 = vpow2.f32 %v1524_v39  ;;  %1554 = vadd.xlane.f32.xlu1 %v1553_v2  ;;  %1551 = vadd.xlane.f32.xlu0 %v1550_v42 }
 0x2bf   : > { %v3744_v43 = vpop.eup %3017 }
 0x2c0   : > { %v3746_v44 = vpop.eup %3019  ;;  %v1556_v63 = vsel %vm1429_vm3, %v3744_v43, 0.0 }
 0x2c1   : > { %v1559_v45 = vsel %vm1429_vm3, %v3746_v44, 0.0 }
 0x2c2   : > { %1560 = vadd.xlane.f32.xlu1 %v1559_v45  ;;  %1557 = vadd.xlane.f32.xlu0 %v1556_v63  ;;  %v3061_v63 = vld [vmem:[%s3437_s23 + $0x8] sm:$0xff] }
 0x2c3   : > { %v3752_v48 = vpop.eup %3021 }
 0x2c4   : > { %v3754_v49 = vpop.eup %3023  ;;  %v1562_v50 = vsel %vm1429_vm3, %v3752_v48, 0.0 }
 0x2c5   : > { %v1565_v52 = vsel %vm1429_vm3, %v3754_v49, 0.0 }
 0x2c6   : > { %1566 = vadd.xlane.f32.xlu1 %v1565_v52  ;;  %1563 = vadd.xlane.f32.xlu0 %v1562_v50  ;;  %v3063_v50 = vld [vmem:[%s3488_s20 + $0x8] sm:$0xff] }
 0x2c7   : > { %v3761_v23 = vpop.eup %3025 }
 0x2c8   : > { %v3763_v55 = vpop.eup %3027  ;;  %v1568_v56 = vsel %vm1429_vm3, %v3761_v23, 0.0 }
 0x2c9   : > { %v1571_v58 = vsel %vm1429_vm3, %v3763_v55, 0.0 }
 0x2ca   : > { %1572 = vadd.xlane.f32.xlu1 %v1571_v58  ;;  %1569 = vadd.xlane.f32.xlu0 %v1568_v56  ;;  %v3064_v58 = vld [vmem:[%s3437_s23] sm:$0xff] }
 0x337   : > { %v1531_v24 = vpop.xlane.xlu1 %1530 }
 0x338   : > { %3029 = vrcp.f32 %v1531_v24 }
 0x33b   : > { %v1528_v59 = vpop.xlane.xlu0 %1527 }
 0x33c   : > { %v1537_v61 = vpop.xlane.xlu1 %1536  ;;  %3031 = vrcp.f32 %v1528_v59  ;;  %v3065_v59 = vld [vmem:[%s3392_s18] sm:$0xff] }
 0x33d   : > { %3033 = vrcp.f32 %v1537_v61 }
 0x33f   : > { %v1534_v62 = vpop.xlane.xlu0 %1533 }
 0x342   : > { %v3030_v29 = vpop.eup %3029 }
 0x343   : > { %v1543_v34 = vpop.xlane.xlu1 %1542  ;;  %v1591_v0 = vmul.f32 %v3030_v29, %v3695_v27  ;;  %v1540_v1 = vpop.xlane.xlu0 %1539 }
 0x344   : > { %3035 = vrcp.f32 %v1543_v34  ;;  %v3066_v34 = vld [vmem:[%s3488_s20] sm:$0xff] }
 0x345   : > { %1714 = vperm.xlu1 %2947, %v1591_v0   ;;  %1904 = vperm.xlu0 %2949, %v1591_v0   ;;  %3037 = vrcp.f32 %v1540_v1 }
 0x346   : > { %v3032_v40 = vpop.eup %3031 }
 0x347   : > { %v1590_v4 = vmul.f32 %v3032_v40, %v3701_v35  ;;  %v3034_v5 = vpop.eup %3033  ;;  %v1549_v7 = vpop.xlane.xlu1 %1548 }
 0x348   : > { %v1593_v41 = vmul.f32 %v3034_v5, %v3703_v3  ;;  %3039 = vrcp.f32 %v1549_v7  ;;  %v1546_v9 = vpop.xlane.xlu0 %1545  ;;  %v3067_v5 = vld [vmem:[%s3437_s23 + $0x18] sm:$0xff] }
 0x349   : > { %2948 = vset.pattern.permute.xlu1 %v3242_v6  ;;  %2951 = vset.pattern.permute.xlu0 %v3242_v6  ;;  %3041 = vrcp.f32 %v1546_v9  ;;  %v3068_v7 = vld [vmem:[%s3392_s18 + $0x18] sm:$0xff] }
 0x34a   : > { %1808 = vperm.xlu1 %2948, %v1591_v0   ;;  %1804 = vperm.xlu0 %2951, %v1590_v4   ;;  %3043 = vrcp.f32 %v1534_v62  ;;  %v3069_v9 = vld [vmem:[%s3488_s20 + $0x18] sm:$0xff] }
 0x34b   : > { %v1555_v12 = vpop.xlane.xlu1 %1554 }
 0x34c   : > { %3045 = vrcp.f32 %v1555_v12  ;;  %v1552_v14 = vpop.xlane.xlu0 %1551 }
 0x34d   : > { %3047 = vrcp.f32 %v1552_v14 }
 0x34e   : > { %v3036_v27 = vpop.eup %3035  ;;  %2950 = vset.pattern.permute.xlu1 %v3238_v10  ;;  %1816 = vperm.xlu0 %2951, %v1593_v41  }
 0x34f   : > { %1709 = vperm.xlu1 %2950, %v1590_v4   ;;  %v1595_v35 = vmul.f32 %v3036_v27, %v3718_v15  ;;  %v3038_v11 = vpop.eup %3037  ;;  %v1561_v17 = vpop.xlane.xlu1 %1560 }
 0x350   : > { %v1594_v13 = vmul.f32 %v3038_v11, %v3715_v18  ;;  %3049 = vrcp.f32 %v1561_v17  ;;  %v1558_v22 = vpop.xlane.xlu0 %1557 }
 0x351   : > { %3051 = vrcp.f32 %v1558_v22  ;;  %v3073_v22 = vld [vmem:[%s3437_s23 + $0x28] sm:$0xff] }
 0x352   : > { %1824 = vperm.xlu0 %2951, %v1595_v35   ;;  %v3040_v3 = vpop.eup %3039 }
 0x353   : > { %2952 = vset.pattern.permute.xlu1 %v3241_v53  ;;  %v3781_v47 = vmul.f32 %v3040_v3, %v3728_v26  ;;  %v3042_v19 = vpop.eup %3041  ;;  %v1567_v51 = vpop.xlane.xlu1 %1566  ;;  %v3070_v3 = vld [vmem:[%s3392_s18 + $0x10] sm:$0xff] }
 0x354   : > { %1900 = vperm.xlu1 %2952, %v1590_v4   ;;  %v3044_v18 = vpop.eup %3043  ;;  %v3787_v15 = vmul.f32 %v3042_v19, %v3725_v8  ;;  %3053 = vrcp.f32 %v1567_v51  ;;  %v1564_v28 = vpop.xlane.xlu0 %1563 }
 0x355   : > { %v1592_v16 = vmul.f32 %v3044_v18, %v3710_v46  ;;  %3055 = vrcp.f32 %v1564_v28 }
 0x356   : > { %2962 = vset.pattern.permute.xlu0 %v3241_v53  ;;  %v3046_v20 = vpop.eup %3045 }
 0x357   : > { %1916 = vperm.xlu0 %2962, %v1594_v13   ;;  %v3794_v21 = vmul.f32 %v3046_v20, %v3738_v38  ;;  %v3048_v54 = vpop.eup %3047  ;;  %v1573_v31 = vpop.xlane.xlu1 %1572  ;;  %v3072_v20 = vld [vmem:[%s3488_s20 + $0x10] sm:$0xff] }
 0x358   : > { %2953 = vset.pattern.permute.xlu1 %v3238_v10  ;;  %v3800_v8 = vmul.f32 %v3048_v54, %v3735_v36  ;;  %3057 = vrcp.f32 %v1573_v31  ;;  %v1570_v36 = vpop.xlane.xlu0 %1569 }
 0x359   : > { %1724 = vperm.xlu1 %2953, %v1593_v41   ;;  %3059 = vrcp.f32 %v1570_v36 }
 0x35a   : > { %v3050_v46 = vpop.eup %3049 }
 0x35b   : > { %2964 = vset.pattern.permute.xlu0 %v3242_v6  ;;  %v1601_v25 = vmul.f32 %v3050_v46, %v3746_v44  ;;  %v3052_v26 = vpop.eup %3051  ;;  %v3074_v46 = vld [vmem:[%s3392_s18 + $0x28] sm:$0xff] }
 0x35c   : > { %1832 = vperm.xlu0 %2964, %v3781_v47   ;;  %v1600_v30 = vmul.f32 %v3052_v26, %v3744_v43 }
 0x35d   : > { %2954 = vset.pattern.permute.xlu1 %v3241_v53 }
 0x35e   : > { %1912 = vperm.xlu1 %2954, %v1593_v41   ;;  %v3054_v60 = vpop.eup %3053 }
 0x35f   : > { %v1603_v32 = vmul.f32 %v3054_v60, %v3754_v49  ;;  %v3056_v33 = vpop.eup %3055 }
 0x360   : > { %2968 = vset.pattern.permute.xlu0 %v3241_v53  ;;  %v1602_v57 = vmul.f32 %v3056_v33, %v3752_v48  ;;  %v3062_v48 = vld [vmem:[%s3392_s18 + $0x8] sm:$0xff] }
 0x361   : > { %1924 = vperm.xlu0 %2968, %v3787_v15  }
 0x362   : > { %2955 = vset.pattern.permute.xlu1 %v3238_v10  ;;  %v3058_v37 = vpop.eup %3057 }
 0x363   : > { %1719 = vperm.xlu1 %2955, %v1592_v16   ;;  %v1605_v38 = vmul.f32 %v3058_v37, %v3763_v55  ;;  %v3060_v39 = vpop.eup %3059 }
 0x364   : > { %v1604_v2 = vmul.f32 %v3060_v39, %v3761_v23 }
 0x365   : > { %2970 = vset.pattern.permute.xlu0 %v3242_v6 }
 0x366   : > { %1840 = vperm.xlu0 %2970, %v3794_v21  }
 0x367   : > { %2956 = vset.pattern.permute.xlu1 %v3242_v6 }
 0x368   : > { %1812 = vperm.xlu1 %2956, %v1592_v16  }
 0x36a   : > { %2972 = vset.pattern.permute.xlu0 %v3238_v10 }
 0x36b   : > { %1749 = vperm.xlu0 %2972, %v3800_v8  }
 0x36c   : > { %2957 = vset.pattern.permute.xlu1 %v3241_v53 }
 0x36d   : > { %1908 = vperm.xlu1 %2957, %v1592_v16  }
 0x36f   : > { %2974 = vset.pattern.permute.xlu0 %v3241_v53 }
 0x370   : > { %1932 = vperm.xlu0 %2974, %v3800_v8  }
 0x371   : > { %2958 = vset.pattern.permute.xlu1 %v3238_v10 }
 0x372   : > { %1734 = vperm.xlu1 %2958, %v1595_v35  }
 0x374   : > { %2976 = vset.pattern.permute.xlu0 %v3242_v6 }
 0x375   : > { %1848 = vperm.xlu0 %2976, %v1601_v25  }
 0x376   : > { %2959 = vset.pattern.permute.xlu1 %v3241_v53 }
 0x377   : > { %1920 = vperm.xlu1 %2959, %v1595_v35  }
 0x379   : > { %2978 = vset.pattern.permute.xlu0 %v3238_v10 }
 0x37a   : > { %1759 = vperm.xlu0 %2978, %v1600_v30  }
 0x37b   : > { %2960 = vset.pattern.permute.xlu1 %v3238_v10 }
 0x37c   : > { %1729 = vperm.xlu1 %2960, %v1594_v13  }
 0x37e   : > { %2980 = vset.pattern.permute.xlu0 %v3241_v53 }
 0x37f   : > { %1940 = vperm.xlu0 %2980, %v1600_v30  }
 0x380   : > { %2961 = vset.pattern.permute.xlu1 %v3242_v6 }
 0x381   : > { %1820 = vperm.xlu1 %2961, %v1594_v13  }
 0x383   : > { %2982 = vset.pattern.permute.xlu0 %v3242_v6 }
 0x384   : > { %1856 = vperm.xlu0 %2982, %v1603_v32  }
 0x385   : > { %2963 = vset.pattern.permute.xlu1 %v3238_v10 }
 0x386   : > { %1744 = vperm.xlu1 %2963, %v3781_v47  }
 0x388   : > { %2984 = vset.pattern.permute.xlu0 %v3238_v10 }
 0x389   : > { %1769 = vperm.xlu0 %2984, %v1602_v57  }
 0x38a   : > { %2965 = vset.pattern.permute.xlu1 %v3241_v53 }
 0x38b   : > { %1928 = vperm.xlu1 %2965, %v3781_v47   ;;  %v3071_v47 = vld [vmem:[%s3437_s23 + $0x10] sm:$0xff] }
 0x38d   : > { %2986 = vset.pattern.permute.xlu0 %v3241_v53 }
 0x38e   : > { %1948 = vperm.xlu0 %2986, %v1602_v57  }
 0x38f   : > { %2966 = vset.pattern.permute.xlu1 %v3238_v10 }
 0x390   : > { %1739 = vperm.xlu1 %2966, %v3787_v15  }
 0x392   : > { %2988 = vset.pattern.permute.xlu0 %v3242_v6 }
 0x393   : > { %1864 = vperm.xlu0 %2988, %v1605_v38  }
 0x394   : > { %2967 = vset.pattern.permute.xlu1 %v3242_v6 }
 0x395   : > { %1828 = vperm.xlu1 %2967, %v3787_v15  }
 0x397   : > { %2989 = vset.pattern.permute.xlu0 %v3238_v10 }
 0x398   : > { %1779 = vperm.xlu0 %2989, %v1604_v2  }
 0x399   : > { %2969 = vset.pattern.permute.xlu1 %v3238_v10 }
 0x39a   : > { %1754 = vperm.xlu1 %2969, %v3794_v21  }
 0x39c   : > { %2991 = vset.pattern.permute.xlu0 %v3241_v53 }
 0x39d   : > { %1956 = vperm.xlu0 %2991, %v1604_v2  }
 0x39e   : > { %2971 = vset.pattern.permute.xlu1 %v3241_v53 }
 0x39f   : > { %1936 = vperm.xlu1 %2971, %v3794_v21  }
 0x3a3   : > { %2973 = vset.pattern.permute.xlu1 %v3242_v6 }
 0x3a4   : > { %1836 = vperm.xlu1 %2973, %v3800_v8  }
 0x3a8   : > { %2975 = vset.pattern.permute.xlu1 %v3238_v10 }
 0x3a9   : > { %1764 = vperm.xlu1 %2975, %v1601_v25  }
 0x3ad   : > { %2977 = vset.pattern.permute.xlu1 %v3241_v53 }
 0x3ae   : > { %1944 = vperm.xlu1 %2977, %v1601_v25  }
 0x3b2   : > { %2979 = vset.pattern.permute.xlu1 %v3242_v6 }
 0x3b3   : > { %1844 = vperm.xlu1 %2979, %v1600_v30   ;;  %v3075_v30 = vld [vmem:[%s3488_s20 + $0x28] sm:$0xff] }
 0x3b7   : > { %2981 = vset.pattern.permute.xlu1 %v3238_v10 }
 0x3b8   : > { %1774 = vperm.xlu1 %2981, %v1603_v32  }
 0x3bc   : > { %2983 = vset.pattern.permute.xlu1 %v3241_v53 }
 0x3bd   : > { %1952 = vperm.xlu1 %2983, %v1603_v32  }
 0x3c1   : > { %2985 = vset.pattern.permute.xlu1 %v3242_v6 }
 0x3c2   : > { %1852 = vperm.xlu1 %2985, %v1602_v57   ;;  %v3076_v57 = vld [vmem:[%s3437_s23 + $0x20] sm:$0xff] }
 0x3c4   : > { %v1715_v42 = vpop.permute.xlu1 %1714  ;;  %v1905_v43 = vpop.permute.xlu0 %1904 }
 0x3c5   : > { %v1788_v45 = vmul.f32 %v3061_v63, %v1715_v42  ;;  %v1964_v52 = vmul.f32 %v3063_v50, %v1905_v43  ;;  %v3080_v50 = vld [vmem:[%s3392_s18 + $0x38] sm:$0xff] }
 0x3c6   : > { %2987 = vset.pattern.permute.xlu1 %v3238_v10 }
 0x3c7   : > { %1784 = vperm.xlu1 %2987, %v1605_v38  }
 0x3c9   : > { %v1809_v44 = vpop.permute.xlu1 %1808  ;;  %v1805_v10 = vpop.permute.xlu0 %1804 }
 0x3ca   : > { %v1868_v49 = vmul.f32 %v3062_v48, %v1809_v44  ;;  %v1867_v61 = vmul.f32 %v3065_v59, %v1805_v10  ;;  %v3079_v48 = vld [vmem:[%s3437_s23 + $0x38] sm:$0xff] }
 0x3cb   : > { %2990 = vset.pattern.permute.xlu1 %v3242_v6  ;;  %v3081_v10 = vld [vmem:[%s3488_s20 + $0x38] sm:$0xff] }
 0x3cc   : > { %v1884_v23 = vadd.f32 %v1868_v49, %v1788_v45  ;;  %1860 = vperm.xlu1 %2990, %v1604_v2   ;;  %v3078_v2 = vld [vmem:[%s3488_s20 + $0x20] sm:$0xff] }
 0x3cd   : > { %v1817_v4 = vpop.permute.xlu0 %1816 }
 0x3ce   : > { %v1980_v55 = vadd.f32 %v1964_v52, %v1884_v23  ;;  %v1710_v56 = vpop.permute.xlu1 %1709 }
 0x3cf   : > { %v1787_v24 = vmul.f32 %v3064_v58, %v1710_v56 }
 0x3d0   : > { %1996 = vst.msk [vmem:[%s3852_s29 + $0x8] sm:$0xff] %vm586_vm0, %v1980_v55  ;;  %2992 = vset.pattern.permute.xlu1 %v3241_v53  ;;  %v1870_v53 = vmul.f32 %v3068_v7, %v1817_v4  ;;  %v3084_v4 = vld [vmem:[%s3488_s20 + $0x30] sm:$0xff] }
 0x3d1   : > { %1960 = vperm.xlu1 %2992, %v1605_v38   ;;  %v1883_v29 = vadd.f32 %v1867_v61, %v1787_v24  ;;  %v1825_v21 = vpop.permute.xlu0 %1824  ;;  %v3077_v38 = vld [vmem:[%s3392_s18 + $0x20] sm:$0xff] }
 0x3d2   : > { %v1872_v51 = vmul.f32 %v3074_v46, %v1825_v21  ;;  %v3090_v21 = vld [vmem:[%s3488_s20 + $0x40] sm:$0xff] }
 0x3d3   : > { %v1901_v62 = vpop.permute.xlu1 %1900 }
 0x3d4   : > { %v1963_v0 = vmul.f32 %v3066_v34, %v1901_v62  ;;  %v3082_v34 = vld [vmem:[%s3437_s23 + $0x30] sm:$0xff] }
 0x3d6   : > { %v1979_v1 = vadd.f32 %v1963_v0, %v1883_v29  ;;  %v1917_v26 = vpop.permute.xlu0 %1916 }
 0x3d7   : > { %v1967_v42 = vmul.f32 %v3078_v2, %v1917_v26 }
 0x3d8   : > { %1995 = vst.msk [vmem:[%s3852_s29] sm:$0xff] %vm586_vm0, %v1979_v1  ;;  %v1725_v40 = vpop.permute.xlu1 %1724  ;;  %v3083_v1 = vld [vmem:[%s3392_s18 + $0x30] sm:$0xff] }
 0x3d9   : > { %v1790_v6 = vmul.f32 %v3067_v5, %v1725_v40 }
 0x3db   : > { %v1886_v27 = vadd.f32 %v1870_v53, %v1790_v6  ;;  %v1833_v33 = vpop.permute.xlu0 %1832 }
 0x3dc   : > { %v1874_v52 = vmul.f32 %v3080_v50, %v1833_v33  ;;  %v3093_v33 = vld [vmem:[%s3488_s20 + $0x58] sm:$0xff] }
 0x3dd   : > { %v1913_v41 = vpop.permute.xlu1 %1912 }
 0x3de   : > { %v1966_v35 = vmul.f32 %v3069_v9, %v1913_v41 }
 0x3e0   : > { %v1982_v11 = vadd.f32 %v1966_v35, %v1886_v27  ;;  %v1925_v43 = vpop.permute.xlu0 %1924  ;;  %v3085_v27 = vld [vmem:[%s3437_s23 + $0x48] sm:$0xff] }
 0x3e1   : > { %v1969_v5 = vmul.f32 %v3084_v4, %v1925_v43  ;;  %v3086_v35 = vld [vmem:[%s3392_s18 + $0x48] sm:$0xff]  ;;  %v3102_v4 = vld [vmem:[%s3488_s20 + $0x60] sm:$0xff] }
 0x3e2   : > { %1998 = vst.msk [vmem:[%s3852_s29 + $0x18] sm:$0xff] %vm586_vm0, %v1982_v11  ;;  %v1720_v12 = vpop.permute.xlu1 %1719 }
 0x3e3   : > { %v1789_v19 = vmul.f32 %v3071_v47, %v1720_v12 }
 0x3e5   : > { %v1841_v23 = vpop.permute.xlu0 %1840 }
 0x3e6   : > { %v1876_v11 = vmul.f32 %v3086_v35, %v1841_v23  ;;  %v3103_v35 = vld [vmem:[%s3437_s23 + $0x70] sm:$0xff] }
 0x3e7   : > { %v1813_v13 = vpop.permute.xlu1 %1812 }
 0x3e8   : > { %v1869_v14 = vmul.f32 %v3070_v3, %v1813_v13  ;;  %v3087_v3 = vld [vmem:[%s3488_s20 + $0x48] sm:$0xff] }
 0x3ea   : > { %v1885_v15 = vadd.f32 %v1869_v14, %v1789_v19  ;;  %v1750_v59 = vpop.permute.xlu0 %1749 }
 0x3ec   : > { %v1909_v18 = vpop.permute.xlu1 %1908 }
 0x3ed   : > { %v1965_v16 = vmul.f32 %v3072_v20, %v1909_v18 }
 0x3ef   : > { %v1981_v17 = vadd.f32 %v1965_v16, %v1885_v15  ;;  %v1933_v29 = vpop.permute.xlu0 %1932  ;;  %v3088_v15 = vld [vmem:[%s3437_s23 + $0x40] sm:$0xff] }
 0x3f0   : > { %v1795_v20 = vmul.f32 %v3088_v15, %v1750_v59  ;;  %v3089_v16 = vld [vmem:[%s3392_s18 + $0x40] sm:$0xff]  ;;  %v3107_v15 = vld [vmem:[%s3392_s18 + $0x78] sm:$0xff] }
 0x3f1   : > { %1997 = vst.msk [vmem:[%s3852_s29 + $0x10] sm:$0xff] %vm586_vm0, %v1981_v17  ;;  %v1735_v54 = vpop.permute.xlu1 %1734 }
 0x3f2   : > { %v1792_v8 = vmul.f32 %v3073_v22, %v1735_v54  ;;  %v1971_v54 = vmul.f32 %v3090_v21, %v1933_v29 }
 0x3f4   : > { %v1888_v28 = vadd.f32 %v1872_v51, %v1792_v8  ;;  %v1849_v41 = vpop.permute.xlu0 %1848 }
 0x3f6   : > { %v1921_v25 = vpop.permute.xlu1 %1920 }
 0x3f7   : > { %v1968_v60 = vmul.f32 %v3075_v30, %v1921_v25  ;;  %v3091_v25 = vld [vmem:[%s3437_s23 + $0x58] sm:$0xff] }
 0x3f9   : > { %v1984_v31 = vadd.f32 %v1968_v60, %v1888_v28  ;;  %v1760_v47 = vpop.permute.xlu0 %1759  ;;  %v3092_v28 = vld [vmem:[%s3392_s18 + $0x58] sm:$0xff] }
 0x3fa   : > { %v1878_v30 = vmul.f32 %v3092_v28, %v1849_v41 }
 0x3fb   : > { %2000 = vst.msk [vmem:[%s3852_s29 + $0x28] sm:$0xff] %vm586_vm0, %v1984_v31  ;;  %v1730_v32 = vpop.permute.xlu1 %1729 }
 0x3fc   : > { %v1791_v37 = vmul.f32 %v3076_v57, %v1730_v32 }
 0x3fe   : > { %v1941_v8 = vpop.permute.xlu0 %1940 }
 0x400   : > { %v1821_v36 = vpop.permute.xlu1 %1820 }
 0x401   : > { %v1871_v39 = vmul.f32 %v3077_v38, %v1821_v36  ;;  %v3094_v38 = vld [vmem:[%s3437_s23 + $0x50] sm:$0xff] }
 0x403   : > { %v1887_v44 = vadd.f32 %v1871_v39, %v1791_v37  ;;  %v1857_v60 = vpop.permute.xlu0 %1856  ;;  %v1797_v39 = vmul.f32 %v3094_v38, %v1760_v47  ;;  %v3106_v47 = vld [vmem:[%s3488_s20 + $0x70] sm:$0xff] }
 0x405   : > { %v1983_v63 = vadd.f32 %v1967_v42, %v1887_v44  ;;  %v1745_v45 = vpop.permute.xlu1 %1744  ;;  %v3095_v42 = vld [vmem:[%s3392_s18 + $0x50] sm:$0xff] }
 0x406   : > { %v1794_v49 = vmul.f32 %v3079_v48, %v1745_v45  ;;  %v3096_v44 = vld [vmem:[%s3488_s20 + $0x50] sm:$0xff] }
 0x407   : > { %1999 = vst.msk [vmem:[%s3852_s29 + $0x20] sm:$0xff] %vm586_vm0, %v1983_v63  ;;  %v1973_v63 = vmul.f32 %v3096_v44, %v1941_v8 }
 0x408   : > { %v1890_v56 = vadd.f32 %v1874_v52, %v1794_v49  ;;  %v1770_v2 = vpop.permute.xlu0 %1769  ;;  %v3097_v52 = vld [vmem:[%s3437_s23 + $0x68] sm:$0xff] }
 0x40a   : > { %v1929_v55 = vpop.permute.xlu1 %1928 }
 0x40b   : > { %v1970_v58 = vmul.f32 %v3081_v10, %v1929_v55  ;;  %v3098_v55 = vld [vmem:[%s3392_s18 + $0x68] sm:$0xff] }
 0x40d   : > { %v1986_v24 = vadd.f32 %v1970_v58, %v1890_v56  ;;  %v1949_v50 = vpop.permute.xlu0 %1948  ;;  %v1880_v56 = vmul.f32 %v3098_v55, %v1857_v60 }
 0x40f   : > { %2002 = vst.msk [vmem:[%s3852_s29 + $0x38] sm:$0xff] %vm586_vm0, %v1986_v24  ;;  %v1740_v61 = vpop.permute.xlu1 %1739  ;;  %v3099_v24 = vld [vmem:[%s3488_s20 + $0x68] sm:$0xff] }
 0x410   : > { %v1793_v0 = vmul.f32 %v3082_v34, %v1740_v61  ;;  %v3100_v34 = vld [vmem:[%s3437_s23 + $0x60] sm:$0xff] }
 0x412   : > { %v1865_v61 = vpop.permute.xlu0 %1864 }
 0x414   : > { %v1829_v62 = vpop.permute.xlu1 %1828 }
 0x415   : > { %v1873_v40 = vmul.f32 %v3083_v1, %v1829_v62  ;;  %v3101_v1 = vld [vmem:[%s3392_s18 + $0x60] sm:$0xff] }
 0x417   : > { %v1889_v6 = vadd.f32 %v1873_v40, %v1793_v0  ;;  %v1799_v0 = vmul.f32 %v3100_v34, %v1770_v2 }
 0x419   : > { %v1985_v7 = vadd.f32 %v1969_v5, %v1889_v6  ;;  %v1755_v53 = vpop.permute.xlu1 %1754  ;;  %v1975_v5 = vmul.f32 %v3102_v4, %v1949_v50 }
 0x41a   : > { %v1796_v9 = vmul.f32 %v3085_v27, %v1755_v53 }
 0x41b   : > { %2001 = vst.msk [vmem:[%s3852_s29 + $0x30] sm:$0xff] %vm586_vm0, %v1985_v7  ;;  %v1780_v7 = vpop.permute.xlu0 %1779 }
 0x41c   : > { %v1892_v13 = vadd.f32 %v1876_v11, %v1796_v9  ;;  %v1801_v11 = vmul.f32 %v3103_v35, %v1780_v7 }
 0x41e   : > { %v1937_v12 = vpop.permute.xlu1 %1936 }
 0x41f   : > { %v1972_v14 = vmul.f32 %v3087_v3, %v1937_v12  ;;  %v1957_v27 = vpop.permute.xlu0 %1956  ;;  %v3104_v12 = vld [vmem:[%s3392_s18 + $0x70] sm:$0xff]  ;;  %v3105_v3 = vld [vmem:[%s3437_s23 + $0x78] sm:$0xff]  ;;  %s2024_s23 = ssub.s32 (%p3347_p5), 25, %s3367_s26 }
 0x420   : > { %p2025_p11 = scmp.lt.s32.totalorder (%p3347_p5), %s2024_s23, 16 }
 0x421   : > { %v1988_v19 = vadd.f32 %v1972_v14, %v1892_v13 }
 0x423   : > { %2004 = vst.msk [vmem:[%s3852_s29 + $0x48] sm:$0xff] %vm586_vm0, %v1988_v19  ;;  %v1837_v18 = vpop.permute.xlu1 %1836  ;;  %v1977_v19 = vmul.f32 %v3106_v47, %v1957_v27 }
 0x424   : > { %v1875_v17 = vmul.f32 %v3089_v16, %v1837_v18 }
 0x426   : > { %v1891_v22 = vadd.f32 %v1875_v17, %v1795_v20  ;;  %v1882_v20 = vmul.f32 %v3107_v15, %v1865_v61 }
 0x428   : > { %v1987_v46 = vadd.f32 %v1971_v54, %v1891_v22  ;;  %v1765_v51 = vpop.permute.xlu1 %1764  ;;  %v3108_v54 = vld [vmem:[%s3488_s20 + $0x78] sm:$0xff] }
 0x429   : > { %v1798_v26 = vmul.f32 %v3091_v25, %v1765_v51 }
 0x42a   : > { %2003 = vst.msk [vmem:[%s3852_s29 + $0x40] sm:$0xff] %vm586_vm0, %v1987_v46 }
 0x42b   : > { %v1894_v32 = vadd.f32 %v1878_v30, %v1798_v26 }
 0x42d   : > { %v1945_v31 = vpop.permute.xlu1 %1944 }
 0x42e   : > { %v1974_v36 = vmul.f32 %v3093_v33, %v1945_v31 }
 0x430   : > { %v1990_v57 = vadd.f32 %v1974_v36, %v1894_v32 }
 0x432   : > { %2006 = vst.msk [vmem:[%s3852_s29 + $0x58] sm:$0xff] %vm586_vm0, %v1990_v57  ;;  %v1845_v37 = vpop.permute.xlu1 %1844 }
 0x433   : > { %v1877_v43 = vmul.f32 %v3095_v42, %v1845_v37 }
 0x435   : > { %v1893_v45 = vadd.f32 %v1877_v43, %v1797_v39 }
 0x437   : > { %v1989_v48 = vadd.f32 %v1973_v63, %v1893_v45  ;;  %v1775_v49 = vpop.permute.xlu1 %1774 }
 0x438   : > { %v1800_v23 = vmul.f32 %v3097_v52, %v1775_v49 }
 0x439   : > { %2005 = vst.msk [vmem:[%s3852_s29 + $0x50] sm:$0xff] %vm586_vm0, %v1989_v48 }
 0x43a   : > { %v1896_v58 = vadd.f32 %v1880_v56, %v1800_v23 }
 0x43c   : > { %v1953_v10 = vpop.permute.xlu1 %1952 }
 0x43d   : > { %v1976_v59 = vmul.f32 %v3099_v24, %v1953_v10 }
 0x43f   : > { %v1992_v62 = vadd.f32 %v1976_v59, %v1896_v58 }
 0x441   : > { %2008 = vst.msk [vmem:[%s3852_s29 + $0x68] sm:$0xff] %vm586_vm0, %v1992_v62  ;;  %v1853_v29 = vpop.permute.xlu1 %1852 }
 0x442   : > { %v1879_v40 = vmul.f32 %v3101_v1, %v1853_v29 }
 0x444   : > { %v1895_v6 = vadd.f32 %v1879_v40, %v1799_v0 }
 0x446   : > { %v1991_v53 = vadd.f32 %v1975_v5, %v1895_v6  ;;  %v1785_v41 = vpop.permute.xlu1 %1784 }
 0x447   : > { %v1802_v14 = vmul.f32 %v3105_v3, %v1785_v41 }
 0x448   : > { %2007 = vst.msk [vmem:[%s3852_s29 + $0x60] sm:$0xff] %vm586_vm0, %v1991_v53 }
 0x449   : > { %v1898_v21 = vadd.f32 %v1882_v20, %v1802_v14 }
 0x44b   : > { %v1861_v9 = vpop.permute.xlu1 %1860 }
 0x44c   : > { %v1881_v13 = vmul.f32 %v3104_v12, %v1861_v9 }
 0x44e   : > { %v1897_v18 = vadd.f32 %v1881_v13, %v1801_v11 }
 0x44f   : > { %2022 = sbr.rel (!%p3347_p5) target bundleno = 1159 (0x487), region = 68 }
 0x450   : > { %v1993_v16 = vadd.f32 %v1977_v19, %v1897_v18  ;;  %v1961_v17 = vpop.permute.xlu1 %1960 }
 0x451   : > { %v1978_v22 = vmul.f32 %v3108_v54, %v1961_v17 }
 0x452   : > { %2009 = vst.msk [vmem:[%s3852_s29 + $0x70] sm:$0xff] %vm586_vm0, %v1993_v16 }
 0x453   : > { %v1994_v8 = vadd.f32 %v1978_v22, %v1898_v21 }
 0x455   : > { %2010 = vst.msk [vmem:[%s3852_s29 + $0x78] sm:$0xff] %vm586_vm0, %v1994_v8 }
 0x456   : > { %s4103_s23 = smov (!%p2025_p11, %s2024_s23), 16 }
 0x457   : > { %s2458_s20 = sshll.u32 %s4103_s23, 7 }
 0x458   : > { %p2461_p12 = scmp.eq.s32.totalorder %s2458_s20, 0 }
 0x459   : > { %s3946_s28 = sshrl.u32 (!%p2461_p12), %s4103_s23, 4 }
 0x45a   : > { %2033 = sbr.rel (%p2461_p12) target bundleno = 1159 (0x487), region = 72  ;;  %p2462_p13 = scmp.le.s32.totalorder (!%p2461_p12), %s3946_s28, 0 }
 0x461   : > { %2295 = sbr.rel (%p2462_p13) target bundleno = 1138 (0x472), region = 171  ;;  %s4093_s26 = smov (!%p2462_p13), %s3940_s4 }
 0x462   : > { %s4094_s18 = smov (!%p2462_p13), %s3852_s29  ;;  %s3955_s30 = smov (!%p2462_p13), 0  }
 0x463   : > { %s3957_s15 = smov (!%p2462_p13), 0  }
 0x468 LB: >> { %v2125_v46 = vld [vmem:[%s3211_s18] sm:$0xff]  ;;  %v2127_v51 = vld [vmem:[%s3211_s18 + $0x8] sm:$0xff]  ;;  %v2129_v25 = vld [vmem:[%s3211_s18 + $0x10] sm:$0xff]  ;;  %s2157_s20 = sadd.s32 1, %s3215_s30  ;;  %s2119_s15 = sadd.s32 1, %s3219_s15   ;;  %s3219_s15 = sphi %s3957_s15, %s2119_s15   ;;  %s3215_s30 = sphi %s3955_s30, %s4095_s30   ;;  %s3211_s18 = sphi %s4094_s18, %s2162_s18   ;;  %s3207_s26 = sphi %s4093_s26, %s2163_s26  }
 0x469   : >> { %2126 = vst [vmem:[%s3207_s26] sm:$0xff] %v2125_v46  ;;  %2128 = vst [vmem:[%s3207_s26 + $0x8] sm:$0xff] %v2127_v51  ;;  %v2131_v26 = vld [vmem:[%s3211_s18 + $0x18] sm:$0xff]  ;;  %v2133_v28 = vld [vmem:[%s3211_s18 + $0x20] sm:$0xff]  ;;  %p2158_p0 = scmp.ge.s32.totalorder %s2157_s20, %s3946_s28  ;;  %p2118_p1 = scmp.ge.s32.totalorder %s2119_s15, %s3946_s28 }
 0x46a   : >> { %2130 = vst [vmem:[%s3207_s26 + $0x10] sm:$0xff] %v2129_v25  ;;  %v2135_v30 = vld [vmem:[%s3211_s18 + $0x28] sm:$0xff]  ;;  %2132 = vst [vmem:[%s3207_s26 + $0x18] sm:$0xff] %v2131_v26  ;;  %v2137_v60 = vld [vmem:[%s3211_s18 + $0x30] sm:$0xff] }
 0x46b   : >> { %2134 = vst [vmem:[%s3207_s26 + $0x20] sm:$0xff] %v2133_v28  ;;  %2136 = vst [vmem:[%s3207_s26 + $0x28] sm:$0xff] %v2135_v30  ;;  %v2139_v31 = vld [vmem:[%s3211_s18 + $0x38] sm:$0xff]  ;;  %v2141_v32 = vld [vmem:[%s3211_s18 + $0x40] sm:$0xff]  ;;  %s4105_s20 = smov (%p2158_p0, %s2157_s20), 0  ;;  %2121 = sbr.rel (!%p2118_p1) target bundleno = 1128 (0x468), region = 177 }
 0x46c   : >> { %2138 = vst [vmem:[%s3207_s26 + $0x30] sm:$0xff] %v2137_v60  ;;  %2140 = vst [vmem:[%s3207_s26 + $0x38] sm:$0xff] %v2139_v31  ;;  %v2143_v33 = vld [vmem:[%s3211_s18 + $0x48] sm:$0xff]  ;;  %v2145_v36 = vld [vmem:[%s3211_s18 + $0x50] sm:$0xff]  ;;  %s2463_s30 = sshll.u32 %s4105_s20, 7 }
 0x46d   : >> { %2142 = vst [vmem:[%s3207_s26 + $0x40] sm:$0xff] %v2141_v32  ;;  %v2147_v57 = vld [vmem:[%s3211_s18 + $0x58] sm:$0xff]  ;;  %2144 = vst [vmem:[%s3207_s26 + $0x48] sm:$0xff] %v2143_v33  ;;  %v2149_v37 = vld [vmem:[%s3211_s18 + $0x60] sm:$0xff] }
 0x46e   : >> { %2146 = vst [vmem:[%s3207_s26 + $0x50] sm:$0xff] %v2145_v36  ;;  %2148 = vst [vmem:[%s3207_s26 + $0x58] sm:$0xff] %v2147_v57  ;;  %v2151_v38 = vld [vmem:[%s3211_s18 + $0x68] sm:$0xff]  ;;  %v2153_v39 = vld [vmem:[%s3211_s18 + $0x70] sm:$0xff] }
 0x46f   : >> { %2150 = vst [vmem:[%s3207_s26 + $0x60] sm:$0xff] %v2149_v37  ;;  %2152 = vst [vmem:[%s3207_s26 + $0x68] sm:$0xff] %v2151_v38  ;;  %v2155_v2 = vld [vmem:[%s3211_s18 + $0x78] sm:$0xff]  ;;  %s2162_s18 = scalar_lea.vmem %s3852_s29, %s2463_s30 [#allocation2]  }
 0x470   : >> { %2154 = vst [vmem:[%s3207_s26 + $0x70] sm:$0xff] %v2153_v39  ;;  %2156 = vst [vmem:[%s3207_s26 + $0x78] sm:$0xff] %v2155_v2  ;;  %s2163_s26 = scalar_lea.vmem %s3940_s4, %s2463_s30   ;;  %s4095_s30 = smov %s4105_s20 }
 0x472 PF: > { %s4015_s16 = sand.u32 15, %s4103_s23   ;;  %s2475_s0 = sshll.u32 %s3946_s28, 7 }
 0x473   : > { %s2168_s1 = scalar_lea.vmem %s3852_s29, %s2475_s0 [#allocation2]   ;;  %s2170_s2 = scalar_lea.vmem %s3940_s4, %s2475_s0  }
 0x474   : > { %p2468_p2 = scmp.le.s32.totalorder %s4015_s16, 0 }
 0x475   : > { %s3221_s3 = smov (!%p2468_p2), %s2170_s2   ;;  %s3225_s5 = smov (!%p2468_p2), %s2168_s1  }
 0x476   : > { %2309 = sbr.rel (%p2468_p2) target bundleno = 1159 (0x487), region = 182  ;;  %s3229_s6 = smov (!%p2468_p2), 0  }
 0x477   : > { %s3233_s20 = smov (!%p2468_p2), 0  }
 0x47d LB: >> { %v2180_v42 = vld [vmem:[%s3227_s5] sm:$0xff]  ;;  %s2182_s23 = sadd.s32 1, %s3231_s6  ;;  %s2174_s20 = sadd.s32 1, %s3235_s20   ;;  %s3235_s20 = sphi %s3233_s20, %s2174_s20   ;;  %s3231_s6 = sphi %s3229_s6, %s3230_s6   ;;  %s3227_s5 = sphi %s3225_s5, %s2187_s5   ;;  %s3223_s3 = sphi %s3221_s3, %s2188_s3  }
 0x47e   : >> { %2181 = vst [vmem:[%s3223_s3] sm:$0xff] %v2180_v42  ;;  %p2183_p3 = scmp.ge.s32.totalorder %s2182_s23, %s4015_s16  ;;  %p2173_p4 = scmp.ge.s32.totalorder %s2174_s20, %s4015_s16 }
 0x480   : >> { %s4107_s23 = smov (%p2183_p3, %s2182_s23), 0  ;;  %2176 = sbr.rel (!%p2173_p4) target bundleno = 1149 (0x47d), region = 188 }
 0x481   : >> { %s2469_s0 = sshll.u32 %s4107_s23, 3  ;;  %s3230_s6 = smov %s4107_s23  }
 0x482   : >> { %s2187_s5 = scalar_lea.vmem %s2168_s1, %s2469_s0 [#allocation2]   ;;  %s2188_s3 = scalar_lea.vmem %s2170_s2, %s2469_s0  }
 0x487 PF: > { %s2471_s6 = sshll.u32 %s3330_s25, 6  ;;  %s2201_s29 = sshll.u32 %s3685_s19, 4  ;;  %s2202_s29 = int_to_ptr.vmem [resolvable:$true] %s2201_s29 }
 0x488   : > { %s2199_s26 = scalar_lea.hbm %s4071_s12, %s2471_s6  ;;  %s3109_s18 = scalar_lea.vmem %s2202_s29, 64 }
 0x489   : > { %p3110_p7 = scmp.ne.s32.totalorder %s2202_s29, %s3109_s18  ;;  %s3243_s3 = smov [#allocation3]  }
 0x48a   : > { %s3113_s5 = sshll.u32 %s3243_s3, 4  ;;  %s3114_s5 = int_to_ptr.vmem [resolvable:$false] %s3113_s5 }
 0x48b   : > { %p3111_p8 = pnand %p3110_p7, %p3347_p5  ;;  %s3115_s1 = scalar_lea.vmem %s3114_s5, 128 }
 0x48c   : > { %p3116_p10 = scmp.lt.s32.totalorder %s2202_s29, %s3114_s5  ;;  %p3117_p11 = scmp.lt.s32.totalorder %s3115_s1, %s3109_s18 }
 0x48d   : > { %p3112_p9 = pneg %p3111_p8 }
 0x48e   : > { %p3118_p12 = por %p3117_p11, %p3116_p10 }
 0x490   : > { %p3119_p13 = pnand %p3118_p12, %p3112_p9 }
 0x492   : > { %3122 = shalt.err (!%p3119_p13)
}
 0x493   : > { %s3123_s2 = scalar_lea.hbm %s2199_s26, 64  ;;  %s3127_s16 = scalar_lea.hbm %s4071_s12, 128 }
 0x494   : > { %p3124_p0 = scmp.ne.s32.totalorder %s2199_s26, %s3123_s2  ;;  %p3128_p3 = scmp.lt.u32.totalorder %s2199_s26, %s4071_s12 }
 0x495   : > { %p3129_p4 = scmp.lt.u32.totalorder %s3127_s16, %s3123_s2  ;;  %p3131_p8 = scmp.lt.u32.totalorder %s3123_s2, %s2199_s26 }
 0x496   : > { %p3125_p1 = pnand %p3124_p0, %p3347_p5 }
 0x497   : > { %p3130_p7 = por %p3129_p4, %p3128_p3 }
 0x498   : > { %p3126_p2 = pneg %p3125_p1 }
 0x499   : > { %p3132_p10 = por %p3131_p8, %p3130_p7 }
 0x49b   : > { %p3133_p9 = pnand %p3132_p10, %p3126_p2 }
 0x49d   : > { %3136 = shalt.err (!%p3133_p9)
}
 0x49e   : > { %s4096_s20 = scalar_lea.sflag [#allocation4], %s3615_s17 }
 0x49f   : > { %2837 = dma.vmem_to_hbm [thread:$0]  (%p3347_p5), %s2202_s29, 64, %s2199_s26, %s4096_s20  }
 0x4a0 PF: > { %p2843_p11 = scmp.ge.s32.totalorder %s3203_s24, 2  ;;  %s2220_s23 = sand.u32 1, %s3191_s21  }
 0x4a1   : > { %s2221_s0 = scalar_lea.sflag [#allocation4], %s2220_s23 }
 0x4a2   : > { %p2840_p12 = pnand %p2843_p11, %p3351_p6 }
 0x4a4   : > { %3186 = dma.done.wait (!%p2840_p12), %s2221_s0, 64  }
 0x4a5   : > { %3188 = vsyncadd (!%p2840_p12), %s2221_s0, 4294967232  ;;  %s4097_s6 = sld [smem:[#allocation6_spill]]  ;;  %s4098_s23 = sld [smem:[#allocation7_spill]] }
 0x4a6   : > { %p23_p13 = scmp.ge.s32.totalorder %s3334_s27, 4   ;;  %s4099_s21 = smov %s3195_s22 }
 0x4a7   : > { %s4101_s24 = smov %s3334_s27 }
 0x4a8   :  { %25 = sbr.rel (!%p23_p13) target bundleno = 11 (0xb), region = 199 }
 0x4ab   : > { %s4100_s22 = smov %s4097_s6 }
 0x4af   :  { %2226 = vsyncpa [#allocation4], 1 }
 0x4b0   :  { %2228 = vsyncpa [#allocation4 + $0x1], 1 }

</bundles_post_ra>
